<compile_context>
chip_gen: v7x
topology: tpu7x:2x2x1
jax: 0.10.0
libtpu: 0.0.40
codegen_flags: <defaults>
</compile_context>

<pallas_src>
import functools

import jax
import jax.numpy as jnp
from jax.experimental import pallas as pl
from jax.experimental.pallas import tpu as pltpu


_LANE = 128
_BLOCK_C_MAX = 2048            # class-dim tile when C is large (multiple of 128)
_VMEM_BLOCK_BUDGET = 20 << 20  # per-step working-set target (HBM tile + f32 temporaries)
_VMEM_LIMIT_BYTES = 40 << 20   # explicit scoped-VMEM limit (under v7x 64 MiB physical)
_NEG_BIG = -1e30               # finite "-inf" for masking padded class columns


def _cdiv(a, b):
    return -(-a // b)


def _round_down(a, m):
    return (a // m) * m


def _choose_blocks(n, c, itemsize):
    """Pick (block_n, block_c, padded_n, padded_c) from dtype size and a VMEM budget."""
    if c <= _BLOCK_C_MAX:
        block_c, c_pad = c, c                       # full class dim in one block
    else:
        block_c = _BLOCK_C_MAX
        c_pad = _cdiv(c, block_c) * block_c

    # Per-element cost: double-buffered HBM tile (2*itemsize) + ~6 live f32/i32
    # (block_n, block_c) temporaries in the kernel body (~24 B).
    max_elems = _VMEM_BLOCK_BUDGET // (2 * itemsize + 24)
    block_n = max(_LANE, _round_down(max_elems // max(block_c, 1), _LANE))
    block_n = min(block_n, 1024)                    # DMA efficiency plateaus ~512-1024 rows

    n_pad = _cdiv(n, _LANE) * _LANE
    block_n = min(block_n, n_pad)
    # Keep >= 2 row blocks when possible so both v7x TensorCores get work.
    if n_pad >= 2 * _LANE and block_n > n_pad // 2:
        block_n = max(_LANE, _round_down(n_pad // 2, _LANE))
    n_pad = _cdiv(n, block_n) * block_n
    return block_n, block_c, n_pad, c_pad


def _label_smooth_kernel(preds_ref, target_ref, out_ref, m_sc, s_sc, w_sc, *,
                         coef_loss, coef_nll, c_true, block_c, c_is_padded):
    # preds_ref:  (block_n, block_c) logits tile (any float dtype)
    # target_ref: (1, block_n) int32 (lane-dense)
    # out_ref:    (1, block_n) f32   (lane-dense, accumulator-resident across class axis)
    # m_sc/s_sc/w_sc: (block_n, 1) f32 online-logsumexp / weighted-sum state
    j = pl.program_id(1)

    @pl.when(j == 0)
    def _():
        m_sc[...] = jnp.full_like(m_sc, -jnp.inf)
        s_sc[...] = jnp.zeros_like(s_sc)
        w_sc[...] = jnp.zeros_like(w_sc)

    x = preds_ref[...].astype(jnp.float32)                         # (block_n, block_c)
    t = target_ref[...].reshape(-1, 1)                             # (block_n, 1) int32

    col_ids = jax.lax.broadcasted_iota(jnp.int32, x.shape, dimension=1) + j * block_c
    ones_col = jnp.ones((block_c, 1), jnp.float32)

    # Fused weighted reduction: eps/C * sum(x) + (1-eps) * x[target].
    # Padded class columns hold x == 0 so they add 0 here (no extra mask needed),
    # and targets never point at them.
    w = jnp.where(col_ids == t, coef_loss + coef_nll, coef_loss)
    w_sc[...] += jnp.dot(w * x, ones_col,
                         preferred_element_type=jnp.float32,
                         precision=jax.lax.Precision.HIGHEST)      # MXU reduce

    # Online logsumexp over the class axis.
    if c_is_padded:
        # Only emitted when C was padded: padded columns must not feed exp().
        x = jnp.where(col_ids < c_true, x, _NEG_BIG)
    m_blk = jnp.max(x, axis=-1, keepdims=True)                     # (block_n, 1)
    m_new = jnp.maximum(m_sc[...], m_blk)
    p = jnp.exp(x - m_new)
    s_blk = jnp.dot(p, ones_col,
                    preferred_element_type=jnp.float32,
                    precision=jax.lax.Precision.HIGHEST)           # MXU reduce
    s_sc[...] = s_sc[...] * jnp.exp(m_sc[...] - m_new) + s_blk
    m_sc[...] = m_new

    @pl.when(j == pl.num_programs(1) - 1)
    def _():
        logz = m_sc[...] + jnp.log(s_sc[...])                      # (block_n, 1)
        # eps/C*loss + (1-eps)*nll == logz - [eps/C*sum(x) + (1-eps)*x_t]
        out_ref[...] = (logz - w_sc[...]).reshape(1, -1)           # lane-dense store


def label_smooth1(preds, target, *, epsilon=0.1):
    """preds: (N, C) float32/bf16 logits; target: (N,) int. Returns (N,) float32."""
    N, C = preds.shape
    itemsize = jnp.dtype(preds.dtype).itemsize
    block_n, block_c, n_pad, c_pad = _choose_blocks(N, C, itemsize)
    n_blocks = n_pad // block_n
    c_blocks = c_pad // block_c

    # Pad rows/cols with zeros (benign: padded cols add 0 to the weighted sum and are
    # masked out of the exp path; padded rows are sliced off the output).
    if (n_pad, c_pad) != (N, C):
        preds = jnp.pad(preds, ((0, n_pad - N), (0, c_pad - C)))
    target_row = jnp.pad(target.astype(jnp.int32), (0, n_pad - N)).reshape(1, n_pad)

    kernel = functools.partial(
        _label_smooth_kernel,
        coef_loss=float(epsilon) / float(C),     # folded at trace time
        coef_nll=1.0 - float(epsilon),
        c_true=C,
        block_c=block_c,
        c_is_padded=(c_pad != C),
    )

    out = pl.pallas_call(
        kernel,
        out_shape=jax.ShapeDtypeStruct((n_blocks, block_n), jnp.float32),
        grid_spec=pltpu.PrefetchScalarGridSpec(
            num_scalar_prefetch=0,
            grid=(n_blocks, c_blocks),                              # reduction axis last
            in_specs=[
                pl.BlockSpec((block_n, block_c), lambda i, j: (i, j)),   # preds tile
                # TODO(synk): consider pipeline_mode=pl.Buffered(3) on v5e if xprof
                # shows exposed per-step DMA.
                pl.BlockSpec((1, block_n), lambda i, j: (0, i)),         # target row slice
            ],
            out_specs=pl.BlockSpec((1, block_n), lambda i, j: (i, 0)),   # resident over j
            scratch_shapes=[
                pltpu.VMEM((block_n, 1), jnp.float32),   # running max
                pltpu.VMEM((block_n, 1), jnp.float32),   # running sum(exp)
                pltpu.VMEM((block_n, 1), jnp.float32),   # running weighted sum
            ],
        ),
        compiler_params=pltpu.CompilerParams(
            dimension_semantics=("parallel", "arbitrary"),
            vmem_limit_bytes=_VMEM_LIMIT_BYTES,
        ),
    )(preds, target_row)
    return out.reshape(n_pad)[:N]


def _reference(preds, target, epsilon=0.1):
    n = preds.shape[-1]
    log_preds = jax.nn.log_softmax(preds.astype(jnp.float32), axis=-1)
    loss = -jnp.sum(log_preds, axis=-1)
    nll = -jnp.take_along_axis(log_preds, target[:, None].astype(jnp.int32), axis=-1)[:, 0]
    return epsilon * loss / n + (1 - epsilon) * nll


if __name__ == "__main__":
    key = jax.random.PRNGKey(0)
    kp, kt, kp2, kt2 = jax.random.split(key, 4)

    # Small primary example (batch of 8 samples, 32 classes).
    N, C = 8, 32
    preds = jax.random.normal(kp, (N, C), dtype=jnp.float32)
    target = jax.random.randint(kt, (N,), 0, C, dtype=jnp.int32)

    out = jax.block_until_ready(label_smooth1(preds, target, epsilon=0.1))
    ref = _reference(preds, target, epsilon=0.1)
    assert out.shape == (N,)
    assert jnp.allclose(out, ref, atol=1e-4, rtol=1e-4), (out, ref)

    # Secondary sanity check exercising row padding, class-dim tiling + masking, bf16.
    N2, C2 = 200, 2176  # C2 > block_c -> two class blocks, last one partially padded
    preds2 = jax.random.normal(kp2, (N2, C2)).astype(jnp.bfloat16)
    target2 = jax.random.randint(kt2, (N2,), 0, C2, dtype=jnp.int32)
    out2 = jax.block_until_ready(label_smooth1(preds2, target2, epsilon=0.1))
    ref2 = _reference(preds2, target2, epsilon=0.1)
    assert out2.shape == (N2,)
    assert jnp.allclose(out2, ref2, atol=2e-3, rtol=2e-3), (out2, ref2)

    print("KERNEL_OK")
</pallas_src>

<mosaic_0001>
module attributes {stable_mosaic.version = 11 : i64} {
  func.func @_label_smooth_kernel(%arg0: i32, %arg1: i32, %arg2: memref<128x32xf32, #tpu.memory_space<vmem>>, %arg3: memref<1x128xi32, #tpu.memory_space<vmem>>, %arg4: memref<1x128xf32, #tpu.memory_space<vmem>>, %arg5: memref<128x1xf32, #tpu.memory_space<vmem>>, %arg6: memref<128x1xf32, #tpu.memory_space<vmem>>, %arg7: memref<128x1xf32, #tpu.memory_space<vmem>>) attributes {dimension_semantics = [#tpu.dimension_semantics<parallel>, #tpu.dimension_semantics<arbitrary>], iteration_bounds = array<i64: 1, 1>, scalar_prefetch = 0 : i64, scratch_operands = 3 : i64, tpu.core_type = #tpu.core_type<tc>, window_params = [{transform_indices = @transform_0, window_bounds = array<i64: 128, 32>}, {transform_indices = @transform_1, window_bounds = array<i64: 1, 128>}, {transform_indices = @transform_2, window_bounds = array<i64: 1, 128>}]} {
    %c0_i32 = arith.constant 0 : i32
    %0 = arith.cmpi eq, %arg1, %c0_i32 : i32
    %1 = arith.extui %0 : i1 to i32
    %c0_i32_0 = arith.constant 0 : i32
    %2 = arith.cmpi ne, %1, %c0_i32_0 : i32
    scf.if %2 {
      %cst_25 = arith.constant 0xFF800000 : f32
      %40 = vector.broadcast %cst_25 : f32 to vector<128x1xf32>
      %c0_26 = arith.constant 0 : index
      %c0_27 = arith.constant 0 : index
      %41 = vector.load %arg5[%c0_26, %c0_27] : memref<128x1xf32, #tpu.memory_space<vmem>>, vector<128x1xf32>
      tpu.vector_store %arg5[%c0_26, %c0_27], %40 {strides = array<i32>} : memref<128x1xf32, #tpu.memory_space<vmem>>, vector<128x1xf32>,
      %cst_28 = arith.constant 0.000000e+00 : f32
      %42 = vector.broadcast %cst_28 : f32 to vector<128x1xf32>
      %c0_29 = arith.constant 0 : index
      %c0_30 = arith.constant 0 : index
      %43 = vector.load %arg6[%c0_29, %c0_30] : memref<128x1xf32, #tpu.memory_space<vmem>>, vector<128x1xf32>
      tpu.vector_store %arg6[%c0_29, %c0_30], %42 {strides = array<i32>} : memref<128x1xf32, #tpu.memory_space<vmem>>, vector<128x1xf32>,
      %cst_31 = arith.constant 0.000000e+00 : f32
      %44 = vector.broadcast %cst_31 : f32 to vector<128x1xf32>
      %c0_32 = arith.constant 0 : index
      %c0_33 = arith.constant 0 : index
      %45 = vector.load %arg7[%c0_32, %c0_33] : memref<128x1xf32, #tpu.memory_space<vmem>>, vector<128x1xf32>
      tpu.vector_store %arg7[%c0_32, %c0_33], %44 {strides = array<i32>} : memref<128x1xf32, #tpu.memory_space<vmem>>, vector<128x1xf32>,
    } else {
    }
    %c0 = arith.constant 0 : index
    %c0_1 = arith.constant 0 : index
    %3 = vector.load %arg2[%c0, %c0_1] : memref<128x32xf32, #tpu.memory_space<vmem>>, vector<128x32xf32>
    %c0_2 = arith.constant 0 : index
    %c0_3 = arith.constant 0 : index
    %4 = vector.load %arg3[%c0_2, %c0_3] : memref<1x128xi32, #tpu.memory_space<vmem>>, vector<1x128xi32>
    %5 = vector.shape_cast %4 : vector<1x128xi32> to vector<128x1xi32>
    %6 = tpu.iota {dimensions = array<i32: 1>} : vector<128x32xi32>
    %c32_i32 = arith.constant 32 : i32
    %7 = arith.muli %arg1, %c32_i32 : i32
    %8 = vector.broadcast %7 : i32 to vector<128x32xi32>
    %9 = arith.addi %6, %8 : vector<128x32xi32>
    %cst = arith.constant 1.000000e+00 : f32
    %10 = vector.broadcast %cst : f32 to vector<32x1xf32>
    %11 = vector.broadcast %5 : vector<128x1xi32> to vector<128x32xi32>
    %12 = arith.cmpi eq, %9, %11 : vector<128x32xi32>
    %cst_4 = arith.constant 0.903124988 : f32
    %cst_5 = arith.constant 3.125000e-03 : f32
    %13 = vector.broadcast %cst_4 : f32 to vector<128x32xf32>
    %14 = vector.broadcast %cst_5 : f32 to vector<128x32xf32>
    %15 = arith.select %12, %13, %14 : vector<128x32xi1>, vector<128x32xf32>
    %c0_6 = arith.constant 0 : index
    %c0_7 = arith.constant 0 : index
    %16 = vector.load %arg7[%c0_6, %c0_7] : memref<128x1xf32, #tpu.memory_space<vmem>>, vector<128x1xf32>
    %17 = arith.mulf %15, %3 : vector<128x32xf32>
    %cst_8 = arith.constant dense<0.000000e+00> : vector<128x1xf32>
    %18 = tpu.matmul %17, %10, %cst_8 {dimension_numbers = #tpu.dot_dimension_numbers<[1], [0], [0], [1], [0, 0, 1, 1], [], []>, precision = #tpu.contract_precision<fp32>} : vector<128x32xf32>, vector<32x1xf32>, vector<128x1xf32> -> vector<128x1xf32>
    %19 = arith.addf %16, %18 : vector<128x1xf32>
    %c0_9 = arith.constant 0 : index
    %c0_10 = arith.constant 0 : index
    %20 = vector.load %arg7[%c0_9, %c0_10] : memref<128x1xf32, #tpu.memory_space<vmem>>, vector<128x1xf32>
    tpu.vector_store %arg7[%c0_9, %c0_10], %19 {strides = array<i32>} : memref<128x1xf32, #tpu.memory_space<vmem>>, vector<128x1xf32>,
    %cst_11 = arith.constant dense<0xFF800000> : vector<128xf32>
    %21 = vector.multi_reduction <maximumf>, %3, %cst_11 [1] : vector<128x32xf32> to vector<128xf32>
    %22 = vector.shape_cast %21 : vector<128xf32> to vector<128x1xf32>
    %c0_12 = arith.constant 0 : index
    %c0_13 = arith.constant 0 : index
    %23 = vector.load %arg5[%c0_12, %c0_13] : memref<128x1xf32, #tpu.memory_space<vmem>>, vector<128x1xf32>
    %24 = arith.maximumf %23, %22 : vector<128x1xf32>
    %25 = vector.broadcast %24 : vector<128x1xf32> to vector<128x32xf32>
    %26 = arith.subf %3, %25 : vector<128x32xf32>
    %27 = math.exp %26 : vector<128x32xf32>
    %cst_14 = arith.constant dense<0.000000e+00> : vector<128x1xf32>
    %28 = tpu.matmul %27, %10, %cst_14 {dimension_numbers = #tpu.dot_dimension_numbers<[1], [0], [0], [1], [0, 0, 1, 1], [], []>, precision = #tpu.contract_precision<fp32>} : vector<128x32xf32>, vector<32x1xf32>, vector<128x1xf32> -> vector<128x1xf32>
    %c0_15 = arith.constant 0 : index
    %c0_16 = arith.constant 0 : index
    %29 = vector.load %arg6[%c0_15, %c0_16] : memref<128x1xf32, #tpu.memory_space<vmem>>, vector<128x1xf32>
    %c0_17 = arith.constant 0 : index
    %c0_18 = arith.constant 0 : index
    %30 = vector.load %arg5[%c0_17, %c0_18] : memref<128x1xf32, #tpu.memory_space<vmem>>, vector<128x1xf32>
    %31 = arith.subf %30, %24 : vector<128x1xf32>
    %32 = math.exp %31 : vector<128x1xf32>
    %33 = arith.mulf %29, %32 : vector<128x1xf32>
    %34 = arith.addf %33, %28 : vector<128x1xf32>
    %c0_19 = arith.constant 0 : index
    %c0_20 = arith.constant 0 : index
    %35 = vector.load %arg6[%c0_19, %c0_20] : memref<128x1xf32, #tpu.memory_space<vmem>>, vector<128x1xf32>
    tpu.vector_store %arg6[%c0_19, %c0_20], %34 {strides = array<i32>} : memref<128x1xf32, #tpu.memory_space<vmem>>, vector<128x1xf32>,
    %c0_21 = arith.constant 0 : index
    %c0_22 = arith.constant 0 : index
    %36 = vector.load %arg5[%c0_21, %c0_22] : memref<128x1xf32, #tpu.memory_space<vmem>>, vector<128x1xf32>
    tpu.vector_store %arg5[%c0_21, %c0_22], %24 {strides = array<i32>} : memref<128x1xf32, #tpu.memory_space<vmem>>, vector<128x1xf32>,
    %c0_i32_23 = arith.constant 0 : i32
    %37 = arith.cmpi eq, %arg1, %c0_i32_23 : i32
    %38 = arith.extui %37 : i1 to i32
    %c0_i32_24 = arith.constant 0 : i32
    %39 = arith.cmpi ne, %38, %c0_i32_24 : i32
    scf.if %39 {
      %c0_25 = arith.constant 0 : index
      %c0_26 = arith.constant 0 : index
      %40 = vector.load %arg5[%c0_25, %c0_26] : memref<128x1xf32, #tpu.memory_space<vmem>>, vector<128x1xf32>
      %c0_27 = arith.constant 0 : index
      %c0_28 = arith.constant 0 : index
      %41 = vector.load %arg6[%c0_27, %c0_28] : memref<128x1xf32, #tpu.memory_space<vmem>>, vector<128x1xf32>
      %42 = math.log %41 : vector<128x1xf32>
      %43 = arith.addf %40, %42 : vector<128x1xf32>
      %c0_29 = arith.constant 0 : index
      %c0_30 = arith.constant 0 : index
      %44 = vector.load %arg7[%c0_29, %c0_30] : memref<128x1xf32, #tpu.memory_space<vmem>>, vector<128x1xf32>
      %45 = arith.subf %43, %44 : vector<128x1xf32>
      %46 = vector.shape_cast %45 : vector<128x1xf32> to vector<1x128xf32>
      %c0_31 = arith.constant 0 : index
      %c0_32 = arith.constant 0 : index
      %47 = vector.load %arg4[%c0_31, %c0_32] : memref<1x128xf32, #tpu.memory_space<vmem>>, vector<1x128xf32>
      tpu.vector_store %arg4[%c0_31, %c0_32], %46 {strides = array<i32>} : memref<1x128xf32, #tpu.memory_space<vmem>>, vector<1x128xf32>,
    } else {
    }
    return
  }
  func.func @transform_0(%arg0: i32, %arg1: i32) -> (i32, i32) {
    %c0_i32 = arith.constant 0 : i32
    return %arg0, %arg1 : i32, i32
  }
  func.func @transform_1(%arg0: i32, %arg1: i32) -> (i32, i32) {
    %c0_i32 = arith.constant 0 : i32
    %c0_i32_0 = arith.constant 0 : i32
    return %c0_i32, %arg0 : i32, i32
  }
  func.func @transform_2(%arg0: i32, %arg1: i32) -> (i32, i32) {
    %c0_i32 = arith.constant 0 : i32
    %c0_i32_0 = arith.constant 0 : i32
    return %arg0, %c0_i32 : i32, i32
  }
}

</mosaic_0001>

<bundles_post_ra>
// kernel: tpu_custom_call.1
= control target key start
LH: loop header
LB: loop body
LE: loop exit
PB: predicated region body
PF: predicated region fallthrough
CT: control target
= control target key end

     0   :  { %vm218_vm0 = vcmask 261120   ;;  %s5157_s0 = inlined_call_operand.vmem [shape: f32[128,32], index: 0, kind: input, shape index: {}]   ;;  %s5158_s1 = inlined_call_operand.vmem [shape: s32[1,128], index: 1, kind: input, shape index: {}]   ;;  %s5159_s2 = inlined_call_operand.hbm [shape: f32[1,128], index: 2, kind: output, shape index: {}]  }
   0x1   :  { %v4051_v0 = vld [vmem:[%s5157_s0 + $0x10] sm:$0xff]  ;;  %v4056_v1 = vld [vmem:[%s5157_s0] sm:$0xff]  ;;  %v4061_v2 = vld [vmem:[%s5157_s0 + $0x18] sm:$0xff] }
   0x2   :  { %v1384_v3 = vsel %vm218_vm0, %v4051_v0, -inf  ;;  %v1378_v4 = vsel %vm218_vm0, %v4056_v1, -inf  ;;  %v4070_v5 = vld [vmem:[%s5157_s0 + $0x8] sm:$0xff]  ;;  %v1387_v6 = vsel %vm218_vm0, %v4061_v2, -inf  ;;  %v4084_v9 = vld [vmem:[%s5157_s0 + $0x20] sm:$0xff] }
   0x3   :  { %1385 = vmax.xlane.f32.xlu1 %v1384_v3  ;;  %1379 = vmax.xlane.f32.xlu0 %v1378_v4  ;;  %v1381_v7 = vsel %vm218_vm0, %v4070_v5, -inf  ;;  %v4079_v8 = vld [vmem:[%s5157_s0 + $0x28] sm:$0xff] }
   0x4   :  { %7 = vsyncpa [#allocation6], 0  ;;  %v1393_v10 = vsel %vm218_vm0, %v4079_v8, -inf  ;;  %v1390_v11 = vsel %vm218_vm0, %v4084_v9, -inf  ;;  %vm16_vm1 = vcmask 7168   ;;  %v4093_v12 = vld [vmem:[%s5157_s0 + $0x38] sm:$0xff] }
   0x5   :  { %v4098_v13 = vld [vmem:[%s5157_s0 + $0x30] sm:$0xff]  ;;  %v4027_v14 = vmov -inf   ;;  %v1399_v15 = vsel %vm218_vm0, %v4093_v12, -inf  ;;  %v4123_v17 = vld [vmem:[%s5157_s0 + $0x48] sm:$0xff]  ;;  %v4128_v18 = vld [vmem:[%s5157_s0 + $0x40] sm:$0xff]  ;;  %v4028_v25 = vmov 0  }
   0x6   :  { %19 = vst.msk [vmem:[#allocation2 + $0x10] sm:$0xff] %vm16_vm1, %v4027_v14  ;;  %17 = vst.msk [vmem:[#allocation2] sm:$0xff] %vm16_vm1, %v4027_v14  ;;  %v1396_v16 = vsel %vm218_vm0, %v4098_v13, -inf  ;;  %v1405_v19 = vsel %vm218_vm0, %v4123_v17, -inf  ;;  %v1402_v20 = vsel %vm218_vm0, %v4128_v18, -inf  ;;  %v4137_v21 = vld [vmem:[%s5157_s0 + $0x58] sm:$0xff]  ;;  %3905 = vset.pattern.permute.xlu0 %v4028_v25  ;;  %3906 = vset.pattern.permute.xlu1 %v4028_v25 }
   0x7   :  { %1388 = vmax.xlane.f32.xlu1 %v1387_v6  ;;  %1382 = vmax.xlane.f32.xlu0 %v1381_v7  ;;  %18 = vst.msk [vmem:[#allocation2 + $0x8] sm:$0xff] %vm16_vm1, %v4027_v14  ;;  %20 = vst.msk [vmem:[#allocation2 + $0x18] sm:$0xff] %vm16_vm1, %v4027_v14  ;;  %v4142_v22 = vld [vmem:[%s5157_s0 + $0x50] sm:$0xff]  ;;  %v1411_v23 = vsel %vm218_vm0, %v4137_v21, -inf  ;;  %v4151_v26 = vld [vmem:[%s5157_s0 + $0x68] sm:$0xff]  ;;  %v5162_v32 = vmov 0.0  }
   0x8   :  { %21 = vst.msk [vmem:[#allocation2 + $0x20] sm:$0xff] %vm16_vm1, %v4027_v14  ;;  %22 = vst.msk [vmem:[#allocation2 + $0x28] sm:$0xff] %vm16_vm1, %v4027_v14  ;;  %v1408_v24 = vsel %vm218_vm0, %v4142_v22, -inf  ;;  %v4156_v27 = vld [vmem:[%s5157_s0 + $0x60] sm:$0xff]  ;;  %v1417_v28 = vsel %vm218_vm0, %v4151_v26, -inf  ;;  %v4165_v30 = vld [vmem:[%s5157_s0 + $0x78] sm:$0xff] }
   0x9   :  { %23 = vst.msk [vmem:[#allocation2 + $0x30] sm:$0xff] %vm16_vm1, %v4027_v14  ;;  %24 = vst.msk [vmem:[#allocation2 + $0x38] sm:$0xff] %vm16_vm1, %v4027_v14  ;;  %v1414_v29 = vsel %vm218_vm0, %v4156_v27, -inf  ;;  %v4170_v31 = vld [vmem:[%s5157_s0 + $0x70] sm:$0xff]  ;;  %v1423_v33 = vsel %vm218_vm0, %v4165_v30, -inf }
   0xa   :  { %25 = vst.msk [vmem:[#allocation2 + $0x40] sm:$0xff] %vm16_vm1, %v4027_v14  ;;  %26 = vst.msk [vmem:[#allocation2 + $0x48] sm:$0xff] %vm16_vm1, %v4027_v14  ;;  %v1420_v34 = vsel %vm218_vm0, %v4170_v31, -inf }
   0xb   :  { %27 = vst.msk [vmem:[#allocation2 + $0x50] sm:$0xff] %vm16_vm1, %v4027_v14  ;;  %28 = vst.msk [vmem:[#allocation2 + $0x58] sm:$0xff] %vm16_vm1, %v4027_v14  ;;  %1394 = vmax.xlane.f32.xlu1 %v1393_v10  ;;  %1391 = vmax.xlane.f32.xlu0 %v1390_v11 }
   0xc   :  { %29 = vst.msk [vmem:[#allocation2 + $0x60] sm:$0xff] %vm16_vm1, %v4027_v14  ;;  %30 = vst.msk [vmem:[#allocation2 + $0x68] sm:$0xff] %vm16_vm1, %v4027_v14 }
   0xd   :  { %31 = vst.msk [vmem:[#allocation2 + $0x70] sm:$0xff] %vm16_vm1, %v4027_v14  ;;  %32 = vst.msk [vmem:[#allocation2 + $0x78] sm:$0xff] %vm16_vm1, %v4027_v14  ;;  %v4240_v35 = vld [vmem:[#allocation2 + $0x10] sm:$0xff]  ;;  %v4242_v36 = vld [vmem:[#allocation2] sm:$0xff] }
   0xe   :  { %33 = vst.msk [vmem:[#allocation3] sm:$0xff] %vm16_vm1, %v5162_v32  ;;  %34 = vst.msk [vmem:[#allocation3 + $0x8] sm:$0xff] %vm16_vm1, %v5162_v32  ;;  %v4250_v41 = vld [vmem:[#allocation2 + $0x18] sm:$0xff]  ;;  %v4252_v42 = vld [vmem:[#allocation2 + $0x8] sm:$0xff] }
   0xf   :  { %1400 = vmax.xlane.f32.xlu1 %v1399_v15  ;;  %1397 = vmax.xlane.f32.xlu0 %v1396_v16  ;;  %35 = vst.msk [vmem:[#allocation3 + $0x10] sm:$0xff] %vm16_vm1, %v5162_v32  ;;  %36 = vst.msk [vmem:[#allocation3 + $0x18] sm:$0xff] %vm16_vm1, %v5162_v32  ;;  %v4269_v49 = vld [vmem:[#allocation2 + $0x28] sm:$0xff]  ;;  %v4271_v50 = vld [vmem:[#allocation2 + $0x20] sm:$0xff] }
  0x10   :  { %37 = vst.msk [vmem:[#allocation3 + $0x20] sm:$0xff] %vm16_vm1, %v5162_v32  ;;  %38 = vst.msk [vmem:[#allocation3 + $0x28] sm:$0xff] %vm16_vm1, %v5162_v32  ;;  %v4288_v57 = vld [vmem:[#allocation2 + $0x38] sm:$0xff]  ;;  %v4290_v58 = vld [vmem:[#allocation2 + $0x30] sm:$0xff] }
  0x11   :  { %39 = vst.msk [vmem:[#allocation3 + $0x30] sm:$0xff] %vm16_vm1, %v5162_v32  ;;  %40 = vst.msk [vmem:[#allocation3 + $0x38] sm:$0xff] %vm16_vm1, %v5162_v32  ;;  %v4307_v4 = vld [vmem:[#allocation2 + $0x48] sm:$0xff]  ;;  %v4309_v6 = vld [vmem:[#allocation2 + $0x40] sm:$0xff] }
  0x12   :  { %41 = vst.msk [vmem:[#allocation3 + $0x40] sm:$0xff] %vm16_vm1, %v5162_v32  ;;  %42 = vst.msk [vmem:[#allocation3 + $0x48] sm:$0xff] %vm16_vm1, %v5162_v32 }
  0x13   :  { %1406 = vmax.xlane.f32.xlu1 %v1405_v19  ;;  %1403 = vmax.xlane.f32.xlu0 %v1402_v20  ;;  %43 = vst.msk [vmem:[#allocation3 + $0x50] sm:$0xff] %vm16_vm1, %v5162_v32  ;;  %44 = vst.msk [vmem:[#allocation3 + $0x58] sm:$0xff] %vm16_vm1, %v5162_v32  ;;  %v4326_v19 = vld [vmem:[#allocation2 + $0x58] sm:$0xff]  ;;  %v4328_v20 = vld [vmem:[#allocation2 + $0x50] sm:$0xff] }
  0x14   :  { %45 = vst.msk [vmem:[#allocation3 + $0x60] sm:$0xff] %vm16_vm1, %v5162_v32  ;;  %46 = vst.msk [vmem:[#allocation3 + $0x68] sm:$0xff] %vm16_vm1, %v5162_v32 }
  0x15   :  { %47 = vst.msk [vmem:[#allocation3 + $0x70] sm:$0xff] %vm16_vm1, %v5162_v32  ;;  %48 = vst.msk [vmem:[#allocation3 + $0x78] sm:$0xff] %vm16_vm1, %v5162_v32 }
  0x16   :  { %49 = vst.msk [vmem:[#allocation4] sm:$0xff] %vm16_vm1, %v5162_v32  ;;  %50 = vst.msk [vmem:[#allocation4 + $0x8] sm:$0xff] %vm16_vm1, %v5162_v32 }
  0x17   :  { %1412 = vmax.xlane.f32.xlu1 %v1411_v23  ;;  %1409 = vmax.xlane.f32.xlu0 %v1408_v24  ;;  %51 = vst.msk [vmem:[#allocation4 + $0x10] sm:$0xff] %vm16_vm1, %v5162_v32  ;;  %52 = vst.msk [vmem:[#allocation4 + $0x18] sm:$0xff] %vm16_vm1, %v5162_v32 }
  0x18   :  { %53 = vst.msk [vmem:[#allocation4 + $0x20] sm:$0xff] %vm16_vm1, %v5162_v32  ;;  %54 = vst.msk [vmem:[#allocation4 + $0x28] sm:$0xff] %vm16_vm1, %v5162_v32 }
  0x19   :  { %55 = vst.msk [vmem:[#allocation4 + $0x30] sm:$0xff] %vm16_vm1, %v5162_v32  ;;  %56 = vst.msk [vmem:[#allocation4 + $0x38] sm:$0xff] %vm16_vm1, %v5162_v32 }
  0x1a   :  { %57 = vst.msk [vmem:[#allocation4 + $0x40] sm:$0xff] %vm16_vm1, %v5162_v32  ;;  %58 = vst.msk [vmem:[#allocation4 + $0x48] sm:$0xff] %vm16_vm1, %v5162_v32 }
  0x1b   :  { %1418 = vmax.xlane.f32.xlu1 %v1417_v28  ;;  %1415 = vmax.xlane.f32.xlu0 %v1414_v29  ;;  %59 = vst.msk [vmem:[#allocation4 + $0x50] sm:$0xff] %vm16_vm1, %v5162_v32  ;;  %60 = vst.msk [vmem:[#allocation4 + $0x58] sm:$0xff] %vm16_vm1, %v5162_v32 }
  0x1c   :  { %61 = vst.msk [vmem:[#allocation4 + $0x60] sm:$0xff] %vm16_vm1, %v5162_v32  ;;  %62 = vst.msk [vmem:[#allocation4 + $0x68] sm:$0xff] %vm16_vm1, %v5162_v32 }
  0x1d   :  { %63 = vst.msk [vmem:[#allocation4 + $0x70] sm:$0xff] %vm16_vm1, %v5162_v32  ;;  %64 = vst.msk [vmem:[#allocation4 + $0x78] sm:$0xff] %vm16_vm1, %v5162_v32 }
  0x1e   :  { %5272 = vst [vmem:[#allocation8_spill] sm:$0xff] %v4240_v35  ;;  %5273 = vst [vmem:[#allocation9_spill] sm:$0xff] %v4242_v36 }
  0x1f   :  { %1424 = vmax.xlane.f32.xlu1 %v1423_v33  ;;  %1421 = vmax.xlane.f32.xlu0 %v1420_v34  ;;  %5276 = vst [vmem:[#allocation12_spill] sm:$0xff] %v4250_v41  ;;  %5277 = vst [vmem:[#allocation13_spill] sm:$0xff] %v4252_v42  ;;  %v4346_v34 = vld [vmem:[#allocation2 + $0x68] sm:$0xff] }
  0x20   :  { %5280 = vst [vmem:[#allocation16_spill] sm:$0xff] %v4269_v49  ;;  %5281 = vst [vmem:[#allocation17_spill] sm:$0xff] %v4271_v50 }
  0x21   :  { %5284 = vst [vmem:[#allocation20_spill] sm:$0xff] %v4288_v57  ;;  %5285 = vst [vmem:[#allocation21_spill] sm:$0xff] %v4290_v58 }
  0x22   :  { %5288 = vst [vmem:[#allocation24_spill] sm:$0xff] %v4307_v4  ;;  %5289 = vst [vmem:[#allocation25_spill] sm:$0xff] %v4309_v6 }
  0x23   :  { %5292 = vst [vmem:[#allocation28_spill] sm:$0xff] %v4326_v19  ;;  %5293 = vst [vmem:[#allocation29_spill] sm:$0xff] %v4328_v20 }
  0x24   :  { %5296 = vst [vmem:[#allocation32_spill] sm:$0xff] %v4346_v34 }
  0x90   :  { %v1386_v37 = vpop.xlane.xlu1 %1385  ;;  %v1380_v38 = vpop.xlane.xlu0 %1379 }
  0x91   :  { %v4245_v39 = vmax.f32 %v4240_v35, %v1386_v37  ;;  %v4248_v40 = vmax.f32 %v4242_v36, %v1380_v38  ;;  %v4348_v37 = vld [vmem:[#allocation2 + $0x60] sm:$0xff] }
  0x92   :  { %5297 = vst [vmem:[#allocation33_spill] sm:$0xff] %v4348_v37 }
  0x93   :  { %5274 = vst [vmem:[#allocation10_spill] sm:$0xff] %v4245_v39  ;;  %5275 = vst [vmem:[#allocation11_spill] sm:$0xff] %v4248_v40  ;;  %1460 = vperm.xlu0 %3905, %v4248_v40  }
  0x94   :  { %2826 = vst.msk [vmem:[#allocation2 + $0x10] sm:$0xff] %vm16_vm1, %v4245_v39  ;;  %2824 = vst.msk [vmem:[#allocation2] sm:$0xff] %vm16_vm1, %v4248_v40  ;;  %v1389_v45 = vpop.xlane.xlu1 %1388  ;;  %v1383_v46 = vpop.xlane.xlu0 %1382 }
  0x95   :  { %v4264_v47 = vmax.f32 %v4250_v41, %v1389_v45  ;;  %v4267_v48 = vmax.f32 %v4252_v42, %v1383_v46 }
  0x97   :  { %5278 = vst [vmem:[#allocation14_spill] sm:$0xff] %v4264_v47  ;;  %5279 = vst [vmem:[#allocation15_spill] sm:$0xff] %v4267_v48  ;;  %1465 = vperm.xlu1 %3906, %v4267_v48  }
  0x98   :  { %2827 = vst.msk [vmem:[#allocation2 + $0x18] sm:$0xff] %vm16_vm1, %v4264_v47  ;;  %2825 = vst.msk [vmem:[#allocation2 + $0x8] sm:$0xff] %vm16_vm1, %v4267_v48  ;;  %v1395_v53 = vpop.xlane.xlu1 %1394  ;;  %v1392_v54 = vpop.xlane.xlu0 %1391 }
  0x99   :  { %v4283_v55 = vmax.f32 %v4269_v49, %v1395_v53  ;;  %v4286_v56 = vmax.f32 %v4271_v50, %v1392_v54 }
  0x9b   :  { %5282 = vst [vmem:[#allocation18_spill] sm:$0xff] %v4283_v55  ;;  %5283 = vst [vmem:[#allocation19_spill] sm:$0xff] %v4286_v56  ;;  %1470 = vperm.xlu1 %3906, %v4245_v39  }
  0x9c   :  { %2829 = vst.msk [vmem:[#allocation2 + $0x28] sm:$0xff] %vm16_vm1, %v4283_v55  ;;  %2828 = vst.msk [vmem:[#allocation2 + $0x20] sm:$0xff] %vm16_vm1, %v4286_v56  ;;  %v1401_v61 = vpop.xlane.xlu1 %1400  ;;  %v1398_v62 = vpop.xlane.xlu0 %1397 }
  0x9d   :  { %v4302_v63 = vmax.f32 %v4288_v57, %v1401_v61  ;;  %v4305_v3 = vmax.f32 %v4290_v58, %v1398_v62  ;;  %v4366_v62 = vld [vmem:[#allocation2 + $0x78] sm:$0xff] }
  0x9e   :  { %5300 = vst [vmem:[#allocation36_spill] sm:$0xff] %v4366_v62 }
  0x9f   :  { %5286 = vst [vmem:[#allocation22_spill] sm:$0xff] %v4302_v63  ;;  %5287 = vst [vmem:[#allocation23_spill] sm:$0xff] %v4305_v3  ;;  %1475 = vperm.xlu1 %3906, %v4264_v47  }
  0xa0   :  { %2831 = vst.msk [vmem:[#allocation2 + $0x38] sm:$0xff] %vm16_vm1, %v4302_v63  ;;  %2830 = vst.msk [vmem:[#allocation2 + $0x30] sm:$0xff] %vm16_vm1, %v4305_v3  ;;  %v1407_v11 = vpop.xlane.xlu1 %1406  ;;  %v1404_v14 = vpop.xlane.xlu0 %1403 }
  0xa1   :  { %v4321_v15 = vmax.f32 %v4307_v4, %v1407_v11  ;;  %v4324_v16 = vmax.f32 %v4309_v6, %v1404_v14  ;;  %v4368_v11 = vld [vmem:[#allocation2 + $0x70] sm:$0xff] }
  0xa2   :  { %5301 = vst [vmem:[#allocation37_spill] sm:$0xff] %v4368_v11 }
  0xa3   :  { %5290 = vst [vmem:[#allocation26_spill] sm:$0xff] %v4321_v15  ;;  %5291 = vst [vmem:[#allocation27_spill] sm:$0xff] %v4324_v16  ;;  %1480 = vperm.xlu1 %3906, %v4286_v56   ;;  %1505 = vperm.xlu0 %3905, %v4321_v15  }
  0xa4   :  { %2833 = vst.msk [vmem:[#allocation2 + $0x48] sm:$0xff] %vm16_vm1, %v4321_v15  ;;  %2832 = vst.msk [vmem:[#allocation2 + $0x40] sm:$0xff] %vm16_vm1, %v4324_v16  ;;  %v1413_v25 = vpop.xlane.xlu1 %1412  ;;  %v1410_v28 = vpop.xlane.xlu0 %1409 }
  0xa5   :  { %v4341_v29 = vmax.f32 %v4326_v19, %v1413_v25  ;;  %v4344_v33 = vmax.f32 %v4328_v20, %v1410_v28  ;;  %v5306_v20 = vmov 0.0  }
  0xa7   :  { %5294 = vst [vmem:[#allocation30_spill] sm:$0xff] %v4341_v29  ;;  %5295 = vst [vmem:[#allocation31_spill] sm:$0xff] %v4344_v33  ;;  %1485 = vperm.xlu1 %3906, %v4283_v55   ;;  %1515 = vperm.xlu0 %3905, %v4341_v29  }
  0xa8   :  { %2835 = vst.msk [vmem:[#allocation2 + $0x58] sm:$0xff] %vm16_vm1, %v4341_v29  ;;  %2834 = vst.msk [vmem:[#allocation2 + $0x50] sm:$0xff] %vm16_vm1, %v4344_v33  ;;  %v1419_v46 = vpop.xlane.xlu1 %1418  ;;  %v1416_v53 = vpop.xlane.xlu0 %1415 }
  0xa9   :  { %v4361_v54 = vmax.f32 %v4346_v34, %v1419_v46  ;;  %v4364_v61 = vmax.f32 %v4348_v37, %v1416_v53  ;;  %v5160_v53 = vmov 1.0|1.0  }
  0xaa   :  { %3727 = vmatprep.subr.bf16.mxu1 %v5160_v53  ;;  %3715 = vmatprep.subr.bf16.mxu0 %v5160_v53 }
  0xab   :  { %5298 = vst [vmem:[#allocation34_spill] sm:$0xff] %v4361_v54  ;;  %5299 = vst [vmem:[#allocation35_spill] sm:$0xff] %v4364_v61  ;;  %1490 = vperm.xlu1 %3906, %v4305_v3   ;;  %1525 = vperm.xlu0 %3905, %v4361_v54  }
  0xac   :  { %2837 = vst.msk [vmem:[#allocation2 + $0x68] sm:$0xff] %vm16_vm1, %v4361_v54  ;;  %2836 = vst.msk [vmem:[#allocation2 + $0x60] sm:$0xff] %vm16_vm1, %v4364_v61  ;;  %v1425_v28 = vpop.xlane.xlu1 %1424  ;;  %v1422_v46 = vpop.xlane.xlu0 %1421  ;;  %3728 = vmatpush3.bf16.msra.mxu1 %v5160_v53  ;;  %3716 = vmatpush3.bf16.msra.mxu0 %v5160_v53 }
  0xad   :  { %v4383_v14 = vmax.f32 %v4366_v62, %v1425_v28  ;;  %v4386_v45 = vmax.f32 %v4368_v11, %v1422_v46  ;;  %3729 = vmatprep.subr.bf16.mxu1 %v5160_v53  ;;  %3717 = vmatprep.subr.bf16.mxu0 %v5160_v53  ;;  %v3144_v46 = vld [vmem:[%s5158_s1] ss:$0 sm:$0xff]  ;;  %s4032_s1 = smov [#allocation5]  }
  0xae   :  { %s3136_s14 = sshll.u32 %s4032_s1, 4  ;;  %s3137_s14 = int_to_ptr.vmem [resolvable:$true] %s3136_s14 }
  0xaf   :  { %5302 = vst [vmem:[#allocation38_spill] sm:$0xff] %v4383_v14  ;;  %5303 = vst [vmem:[#allocation39_spill] sm:$0xff] %v4386_v45  ;;  %1495 = vperm.xlu1 %3906, %v4302_v63   ;;  %1535 = vperm.xlu0 %3905, %v4383_v14   ;;  %s4003_s15 = scalar_lea.vmem %s3137_s14, 16  ;;  %s4007_s16 = scalar_lea.vmem %s3137_s14, 32 }
  0xb0   :  { %2839 = vst.msk [vmem:[#allocation2 + $0x78] sm:$0xff] %vm16_vm1, %v4383_v14  ;;  %2838 = vst.msk [vmem:[#allocation2 + $0x70] sm:$0xff] %vm16_vm1, %v4386_v45  ;;  %3730 = vmatpush3.bf16.msra.mxu1 %v5160_v53  ;;  %3718 = vmatpush3.bf16.msra.mxu0 %v5160_v53  ;;  %p4004_p0 = scmp.ne.s32.totalorder %s3137_s14, %s4003_s15  ;;  %p4008_p1 = scmp.lt.s32.totalorder %s3137_s14, %s3137_s14 }
  0xb1   :  { %3573 = vmatprep.subr.mxu1 %v5162_v32  ;;  %3399 = vmatprep.subr.mxu0 %v5162_v32  ;;  %p4009_p2 = scmp.lt.s32.totalorder %s4007_s16, %s4003_s15 }
  0xb3   :  { %1500 = vperm.xlu1 %3906, %v4324_v16   ;;  %91 = vbcast.lane.b32.xlu0 %v3144_v46, 264  ;;  %p4010_p3 = por %p4009_p2, %p4008_p1 }
  0xb5   :  { %p4011_p4 = pnand %p4010_p3, %p4004_p0 }
  0xb7   :  { %1510 = vperm.xlu1 %3906, %v4344_v33   ;;  %99 = vbcast.lane.b32.xlu0 %v3144_v46, 280 }
  0xbb   :  { %1520 = vperm.xlu1 %3906, %v4364_v61   ;;  %107 = vbcast.lane.b32.xlu0 %v3144_v46, 296 }
  0xbf   :  { %1530 = vperm.xlu1 %3906, %v4386_v45   ;;  %115 = vbcast.lane.b32.xlu0 %v3144_v46, 312 }
  0xc3   :  { %87 = vbcast.lane.b32.xlu1 %v3144_v46, 256  ;;  %123 = vbcast.lane.b32.xlu0 %v3144_v46, 328 }
  0xc7   :  { %95 = vbcast.lane.b32.xlu1 %v3144_v46, 272  ;;  %131 = vbcast.lane.b32.xlu0 %v3144_v46, 344 }
  0xcb   :  { %103 = vbcast.lane.b32.xlu1 %v3144_v46, 288  ;;  %139 = vbcast.lane.b32.xlu0 %v3144_v46, 360 }
  0xcf   :  { %111 = vbcast.lane.b32.xlu1 %v3144_v46, 304  ;;  %147 = vbcast.lane.b32.xlu0 %v3144_v46, 376 }
  0xd3   :  { %119 = vbcast.lane.b32.xlu1 %v3144_v46, 320 }
  0xd7   :  { %127 = vbcast.lane.b32.xlu1 %v3144_v46, 336 }
  0xdb   :  { %135 = vbcast.lane.b32.xlu1 %v3144_v46, 352 }
  0xdf   :  { %143 = vbcast.lane.b32.xlu1 %v3144_v46, 368 }
 0x112   :  { %v1461_v28 = vpop.permute.xlu0 %1460 }
 0x113   :  { %v1538_v25 = vsub.f32 %v4056_v1, %v1461_v28 }
 0x115   :  { %v1554_v38 = vmul.f32 1.442695, %v1538_v25 }
 0x116   :  { %v1466_v24 = vpop.permute.xlu1 %1465 }
 0x117   :  { %3907 = vpow2.f32 %v1554_v38  ;;  %v1539_v23 = vsub.f32 %v4070_v5, %v1466_v24 }
 0x119   :  { %v1556_v10 = vmul.f32 1.442695, %v1539_v23 }
 0x11a   :  { %v1471_v7 = vpop.permute.xlu1 %1470 }
 0x11b   :  { %3909 = vpow2.f32 %v1556_v10  ;;  %v1540_v60 = vsub.f32 %v4051_v0, %v1471_v7 }
 0x11d   :  { %v1558_v59 = vmul.f32 1.442695, %v1540_v60 }
 0x11e   :  { %v1476_v43 = vpop.permute.xlu1 %1475 }
 0x11f   :  { %3911 = vpow2.f32 %v1558_v59  ;;  %v1541_v51 = vsub.f32 %v4061_v2, %v1476_v43 }
 0x121   :  { %v3908_v44 = vpop.eup %3907  ;;  %v1560_v46 = vmul.f32 1.442695, %v1541_v51 }
 0x122   :  { %v1481_v52 = vpop.permute.xlu1 %1480  ;;  %v1506_v53 = vpop.permute.xlu0 %1505  ;;  %v1587_v25 = vsel %vm218_vm0, %v3908_v44, 0 }
 0x123   :  { %3913 = vpow2.f32 %v1560_v46  ;;  %v1542_v38 = vsub.f32 %v4084_v9, %v1481_v52  ;;  %v1547_v23 = vsub.f32 %v4123_v17, %v1506_v53  ;;  %v4420_v24 = vand.u32 4294901760, %v1587_v25 }
 0x125   :  { %v3910_v10 = vpop.eup %3909  ;;  %v1562_v7 = vmul.f32 1.442695, %v1542_v38  ;;  %v1572_v60 = vmul.f32 1.442695, %v1547_v23  ;;  %v4423_v59 = vsub.f32 %v1587_v25, %v4420_v24 }
 0x126   :  { %v1486_v43 = vpop.permute.xlu1 %1485  ;;  %v1516_v28 = vpop.permute.xlu0 %1515  ;;  %v1590_v51 = vsel %vm218_vm0, %v3910_v10, 0 }
 0x127   :  { %3915 = vpow2.f32 %v1562_v7  ;;  %v1543_v44 = vsub.f32 %v4079_v8, %v1486_v43  ;;  %v5167_v46 = vand.u32 4294901760, %v4423_v59  ;;  %v4428_v52 = vand.u32 4294901760, %v1590_v51 }
 0x128   :  { %3917 = vpow2.f32 %v1572_v60  ;;  %v1549_v25 = vsub.f32 %v4137_v21, %v1516_v28 }
 0x129   :  { %v3912_v53 = vpop.eup %3911  ;;  %v1564_v32 = vmul.f32 1.442695, %v1543_v44  ;;  %v1702_v38 = vsub.f32 %v4423_v59, %v5167_v46  ;;  %v4435_v10 = vsub.f32 %v1590_v51, %v4428_v52 }
 0x12a   :  { %v1491_v23 = vpop.permute.xlu1 %1490  ;;  %v1526_v45 = vpop.permute.xlu0 %1525  ;;  %v1593_v7 = vsel %vm218_vm0, %v3912_v53, 0  ;;  %v1576_v61 = vmul.f32 1.442695, %v1549_v25 }
 0x12b   :  { %3919 = vpow2.f32 %v1564_v32  ;;  %v1544_v60 = vsub.f32 %v4098_v13, %v1491_v23  ;;  %v1703_v43 = vand.u32 4294901760, %v1702_v38  ;;  %v1551_v11 = vsub.f32 %v4151_v26, %v1526_v45 }
 0x12c   :  { %v5175_v44 = vand.u32 4294901760, %v4435_v10  ;;  %v4441_v14 = vand.u32 4294901760, %v1593_v7 }
 0x12d   :  { %v3914_v62 = vpop.eup %3913  ;;  %v1566_v28 = vmul.f32 1.442695, %v1544_v60  ;;  %3549 = vmatprep.mubr.f32.mxu1 %v1703_v43  ;;  %v1580_v46 = vmul.f32 1.442695, %v1551_v11  ;;  %v5304_v43 = vlaneseq }
 0x12e   :  { %v1496_v37 = vpop.permute.xlu1 %1495  ;;  %v1536_v51 = vpop.permute.xlu0 %1535  ;;  %v1712_v32 = vsub.f32 %v4435_v10, %v5175_v44  ;;  %v4447_v53 = vsub.f32 %v1593_v7, %v4441_v14  ;;  %v1596_v45 = vsel %vm218_vm0, %v3914_v62, 0 }
 0x12f   :  { %3921 = vpow2.f32 %v1566_v28  ;;  %v1545_v38 = vsub.f32 %v4093_v12, %v1496_v37  ;;  %v4451_v23 = vand.u32 4294901760, %v1596_v45  ;;  %v4455_v54 = vand.u32 127, %v5304_v43 }
 0x130   :  { %v1713_v60 = vand.u32 4294901760, %v1712_v32  ;;  %v5177_v25 = vand.u32 4294901760, %v4447_v53  ;;  %3923 = vpow2.f32 %v1576_v61  ;;  %v1553_v62 = vsub.f32 %v4165_v30, %v1536_v51 }
 0x131   :  { %5305 = vst [vmem:[#allocation40_spill] sm:$0xff] %v4455_v54  ;;  %v3916_v34 = vpop.eup %3915  ;;  %v1568_v33 = vmul.f32 1.442695, %v1545_v38  ;;  %v4458_v44 = vsub.f32 %v1596_v45, %v4451_v23 }
 0x132   :  { %v3918_v7 = vpop.eup %3917  ;;  %3550 = vmatmul.mubr.f32.vlgmr.msra.gmra.mrb[0].mxu1 %v1713_v60  ;;  %v1501_v37 = vpop.permute.xlu1 %1500  ;;  %v1722_v11 = vsub.f32 %v4447_v53, %v5177_v25  ;;  %v1599_v28 = vsel %vm218_vm0, %v3916_v34, 0  ;;  %v5187_v25 = vmov 0.003125  }
 0x133   :  { %v92_v32 = vpop.permute.xlu0 %91  ;;  %3925 = vpow2.f32 %v1568_v33  ;;  %v1546_v43 = vsub.f32 %v4128_v18, %v1501_v37  ;;  %v5181_v38 = vand.u32 4294901760, %v4458_v44  ;;  %v4467_v45 = vand.u32 4294901760, %v1599_v28  ;;  %3574 = vmatpush3.msra.mxu1 %v5306_v20 }
 0x134   :  { %3927 = vpow2.f32 %v1580_v46  ;;  %v1723_v61 = vand.u32 4294901760, %v1722_v11  ;;  %vm155_vm2 = vcmp.eq.s32.totalorder %v4455_v54, %v92_v32  ;;  %v1614_v51 = vsel %vm218_vm0, %v3918_v7, 0  ;;  %3599 = vmatprep.subr.mxu1 %v5306_v20 }
 0x135   :  { %v3920_v60 = vpop.eup %3919  ;;  %v1570_v34 = vmul.f32 1.442695, %v1546_v43  ;;  %v1732_v33 = vsub.f32 %v4458_v44, %v5181_v38  ;;  %v4477_v37 = vsub.f32 %v1599_v28, %v4467_v45  ;;  %v171_v29 = vsel %vm155_vm2, 0.903125, %v5187_v25 }
 0x136   :  { %v1584_v46 = vmul.f32 1.442695, %v1553_v62  ;;  %3552 = vmatprep.mubr.f32.mxu1 %v1723_v61  ;;  %v1511_v11 = vpop.permute.xlu1 %1510  ;;  %v203_v32 = vmul.f32 %v171_v29, %v4070_v5  ;;  %v1602_v7 = vsel %vm218_vm0, %v3920_v60, 0  ;;  %v4482_v16 = vand.u32 4294901760, %v1614_v51 }
 0x137   :  { %v100_v19 = vpop.permute.xlu0 %99  ;;  %3929 = vpow2.f32 %v1570_v34  ;;  %v1548_v43 = vsub.f32 %v4142_v22, %v1511_v11  ;;  %v1733_v38 = vand.u32 4294901760, %v1732_v33  ;;  %v5184_v28 = vand.u32 4294901760, %v4477_v37 }
 0x138   :  { %v223_v6 = vsel %vm218_vm0, %v203_v32, 0  ;;  %v4487_v15 = vand.u32 4294901760, %v1602_v7  ;;  %vm157_vm3 = vcmp.eq.s32.totalorder %v4455_v54, %v100_v19  ;;  %v4491_v62 = vsub.f32 %v1614_v51, %v4482_v16 }
 0x139   :  { %v3922_v5 = vpop.eup %3921  ;;  %v1574_v29 = vmul.f32 1.442695, %v1548_v43  ;;  %3553 = vmatmul.mubr.f32.gmra.mrb[2].mxu1 %v1733_v38  ;;  %v1742_v61 = vsub.f32 %v4477_v37, %v5184_v28  ;;  %v4496_v60 = vand.u32 4294901760, %v223_v6  ;;  %v173_v34 = vsel %vm157_vm3, 0.903125, %v5187_v25 }
 0x13a   :  { %5307 = vst [vmem:[#allocation41_spill] sm:$0xff] %v4491_v62  ;;  %3931 = vpow2.f32 %v1584_v46  ;;  %v1521_v33 = vpop.permute.xlu1 %1520  ;;  %v4500_v11 = vsub.f32 %v1602_v7, %v4487_v15  ;;  %v205_v19 = vmul.f32 %v173_v34, %v4061_v2  ;;  %v1605_v51 = vsel %vm218_vm0, %v3922_v5, 0  ;;  %v3924_v4 = vpop.eup %3923 }
 0x13b   :  { %v108_v32 = vpop.permute.xlu0 %107  ;;  %3933 = vpow2.f32 %v1574_v29  ;;  %v1550_v38 = vsub.f32 %v4156_v27, %v1521_v33  ;;  %v1743_v43 = vand.u32 4294901760, %v1742_v61  ;;  %v4508_v25 = vand.u32 4294901760, %v1605_v51 }
 0x13c   :  { %5308 = vst [vmem:[#allocation42_spill] sm:$0xff] %v4500_v11  ;;  %v5194_v3 = vand.u32 4294901760, %v4500_v11  ;;  %v229_v46 = vsel %vm218_vm0, %v205_v19, 0  ;;  %vm159_vm4 = vcmp.eq.s32.totalorder %v4455_v54, %v108_v32  ;;  %v4512_v5 = vsub.f32 %v223_v6, %v4496_v60 }
 0x13d   :  { %v3926_v7 = vpop.eup %3925  ;;  %v1578_v2 = vmul.f32 1.442695, %v1550_v38  ;;  %3555 = vmatprep.mubr.f32.mxu1 %v1743_v43  ;;  %v4514_v29 = vand.u32 4294901760, %v229_v46  ;;  %v5310_v61 = vmov 0.003125   ;;  %v4523_v58 = vsub.f32 %v1605_v51, %v4508_v25 }
 0x13e   :  { %5309 = vst [vmem:[#allocation43_spill] sm:$0xff] %v4512_v5  ;;  %v175_v34 = vsel %vm159_vm4, 0.903125, %v5310_v61  ;;  %v4517_v33 = vpop.eup %3927  ;;  %v1531_v28 = vpop.permute.xlu1 %1530  ;;  %v1752_v19 = vsub.f32 %v4500_v11, %v5194_v3  ;;  %v1608_v38 = vsel %vm218_vm0, %v3926_v7, 0  ;;  %v5312_v57 = vand.u32 4294901760, %v4491_v62 }
 0x13f   :  { %5311 = vst [vmem:[#allocation44_spill] sm:$0xff] %v4523_v58  ;;  %v207_v32 = vmul.f32 %v175_v34, %v4079_v8  ;;  %v116_v6 = vpop.permute.xlu0 %115  ;;  %3935 = vpow2.f32 %v1578_v2  ;;  %v1552_v43 = vsub.f32 %v4170_v31, %v1531_v28  ;;  %v4528_v63 = vand.u32 4294901760, %v1608_v38 }
 0x140   :  { %v4533_v56 = vsub.f32 %v4491_v62, %v5312_v57  ;;  %v1753_v50 = vand.u32 4294901760, %v1752_v19  ;;  %v5198_v3 = vand.u32 4294901760, %v4523_v58  ;;  %vm161_vm5 = vcmp.eq.s32.totalorder %v4455_v54, %v116_v6 }
 0x141   :  { %v235_v51 = vsel %vm218_vm0, %v207_v32, 0  ;;  %v3930_v8 = vpop.eup %3929  ;;  %v1582_v7 = vmul.f32 1.442695, %v1552_v43  ;;  %v4539_v2 = vsub.f32 %v229_v46, %v4514_v29  ;;  %v4542_v28 = vsub.f32 %v1608_v38, %v4528_v63 }
 0x142   :  { %v177_v34 = vsel %vm161_vm5, 0.903125, %v5310_v61  ;;  %3556 = vmatmul.mubr.f32.gmra.mrb[4].mxu1 %v1753_v50  ;;  %v88_v57 = vpop.permute.xlu1 %87  ;;  %v1762_v19 = vsub.f32 %v4523_v58, %v5198_v3  ;;  %v4548_v55 = vand.u32 4294901760, %v235_v51  ;;  %v1611_v6 = vsel %vm218_vm0, %v3930_v8, 0 }
 0x143   :  { %5313 = vst [vmem:[#allocation45_spill] sm:$0xff] %v4539_v2  ;;  %5314 = vst [vmem:[#allocation46_spill] sm:$0xff] %v4542_v28  ;;  %v209_v32 = vmul.f32 %v177_v34, %v4093_v12  ;;  %v124_v43 = vpop.permute.xlu0 %123  ;;  %3937 = vpow2.f32 %v1582_v7  ;;  %vm154_vm6 = vcmp.eq.s32.totalorder %v4455_v54, %v88_v57  ;;  %v5201_v46 = vand.u32 4294901760, %v4542_v28 }
 0x144   :  { %v1793_v38 = vand.u32 4294901760, %v4533_v56  ;;  %v4555_v50 = vpop.eup %3931  ;;  %v170_v49 = vsel %vm154_vm6, 0.903125, %v5310_v61  ;;  %v1763_v39 = vand.u32 4294901760, %v1762_v19  ;;  %v4559_v35 = vand.u32 4294901760, %v1611_v6 }
 0x145   :  { %v241_v3 = vsel %vm218_vm0, %v209_v32, 0  ;;  %v3934_v12 = vpop.eup %3933  ;;  %v202_v8 = vmul.f32 %v170_v49, %v4056_v1  ;;  %v1772_v7 = vsub.f32 %v4542_v28, %v5201_v46  ;;  %vm163_vm7 = vcmp.eq.s32.totalorder %v4455_v54, %v124_v43 }
 0x146   :  { %v4565_v34 = vand.u32 4294901760, %v241_v3  ;;  %3558 = vmatprep.mubr.f32.mxu1 %v1763_v39  ;;  %v96_v56 = vpop.permute.xlu1 %95  ;;  %v4569_v57 = vsub.f32 %v1611_v6, %v4559_v35  ;;  %v179_v19 = vsel %vm163_vm7, 0.903125, %v5310_v61  ;;  %v1617_v32 = vsel %vm218_vm0, %v3934_v12, 0 }
 0x147   :  { %v1620_v47 = vsel %vm218_vm0, %v3924_v4, 0  ;;  %v220_v1 = vsel %vm218_vm0, %v202_v8, 0  ;;  %vm156_vm8 = vcmp.eq.s32.totalorder %v4455_v54, %v96_v56  ;;  %v4577_v49 = vsub.f32 %v235_v51, %v4548_v55  ;;  %v132_v40 = vpop.permute.xlu0 %131 }
 0x148   :  { %5315 = vst [vmem:[#allocation47_spill] sm:$0xff] %v4569_v57  ;;  %v1773_v46 = vand.u32 4294901760, %v1772_v7  ;;  %v4579_v43 = vand.u32 4294901760, %v220_v1  ;;  %v172_v39 = vsel %vm156_vm8, 0.903125, %v5310_v61  ;;  %v5206_v6 = vand.u32 4294901760, %v4569_v57 }
 0x149   :  { %5316 = vst [vmem:[#allocation48_spill] sm:$0xff] %v4577_v49  ;;  %v211_v41 = vmul.f32 %v179_v19, %v4123_v17  ;;  %v3936_v12 = vpop.eup %3935  ;;  %v204_v4 = vmul.f32 %v172_v39, %v4051_v0  ;;  %v4586_v8 = vsub.f32 %v241_v3, %v4565_v34  ;;  %v4588_v56 = vand.u32 4294901760, %v1617_v32 }
 0x14a   :  { %3559 = vmatmul.mubr.f32.gmra.mrb[6].mxu1 %v1773_v46  ;;  %v4590_v51 = vand.u32 4294901760, %v1620_v47  ;;  %v104_v7 = vpop.permute.xlu1 %103  ;;  %v1782_v36 = vsub.f32 %v4569_v57, %v5206_v6  ;;  %v4597_v17 = vsub.f32 %v220_v1, %v4579_v43  ;;  %vm165_vm10 = vcmp.eq.s32.totalorder %v4455_v54, %v132_v40 }
 0x14b   :  { %v247_v48 = vsel %vm218_vm0, %v211_v41, 0  ;;  %v226_v46 = vsel %vm218_vm0, %v204_v4, 0  ;;  %vm158_vm9 = vcmp.eq.s32.totalorder %v4455_v54, %v104_v7  ;;  %v4603_v3 = vsub.f32 %v1617_v32, %v4588_v56 }
 0x14c   :  { %5317 = vst [vmem:[#allocation49_spill] sm:$0xff] %v4597_v17  ;;  %v4606_v19 = vand.u32 4294901760, %v226_v46  ;;  %v174_v39 = vsel %vm158_vm9, 0.903125, %v5310_v61  ;;  %v1783_v6 = vand.u32 4294901760, %v1782_v36  ;;  %v5212_v41 = vand.u32 4294901760, %v4597_v17 }
 0x14d   :  { %5318 = vst [vmem:[#allocation50_spill] sm:$0xff] %v4603_v3  ;;  %v4610_v1 = vpop.eup %3937  ;;  %v206_v0 = vmul.f32 %v174_v39, %v4084_v9  ;;  %v4613_v42 = vand.u32 4294901760, %v247_v48  ;;  %v4617_v32 = vsub.f32 %v1620_v47, %v4590_v51  ;;  %v5321_v62 = vand.u32 4294901760, %v4512_v5 }
 0x14e   :  { %v4620_v40 = vsub.f32 %v226_v46, %v4606_v19  ;;  %3561 = vmatprep.mubr.f32.mxu1 %v1783_v6  ;;  %v112_v7 = vpop.permute.xlu1 %111  ;;  %v335_v36 = vsub.f32 %v4597_v17, %v5212_v41  ;;  %v181_v39 = vsel %vm165_vm10, 0.903125, %v5310_v61  ;;  %v5322_v47 = vand.u32 4294901760, %v4603_v3 }
 0x14f   :  { %5319 = vst [vmem:[#allocation51_spill] sm:$0xff] %v4617_v32  ;;  %v345_v9 = vsub.f32 %v4512_v5, %v5321_v62  ;;  %v232_v4 = vsel %vm218_vm0, %v206_v0, 0  ;;  %vm160_vm11 = vcmp.eq.s32.totalorder %v4455_v54, %v112_v7  ;;  %3562 = vmatmul.mubr.f32.gmra.mrb[8].mxu1 %v1793_v38  ;;  %v5223_v46 = vand.u32 4294901760, %v4617_v32 }
 0x150   :  { %5320 = vst [vmem:[#allocation52_spill] sm:$0xff] %v4620_v40  ;;  %v1802_v6 = vsub.f32 %v4603_v3, %v5322_v47  ;;  %v4635_v57 = vand.u32 4294901760, %v232_v4  ;;  %v176_v41 = vsel %vm160_vm11, 0.903125, %v5310_v61  ;;  %v336_v17 = vand.u32 4294901760, %v335_v36 }
 0x151   :  { %v346_v28 = vand.u32 4294901760, %v345_v9  ;;  %v208_v62 = vmul.f32 %v176_v41, %v4098_v13  ;;  %v1812_v0 = vsub.f32 %v4617_v32, %v5223_v46  ;;  %v213_v38 = vmul.f32 %v181_v39, %v4137_v21 }
 0x152   :  { %v1803_v5 = vand.u32 4294901760, %v1802_v6  ;;  %v4644_v7 = vsub.f32 %v247_v48, %v4613_v42  ;;  %3375 = vmatprep.mubr.f32.mxu0 %v336_v17  ;;  %v120_v47 = vpop.permute.xlu1 %119  ;;  %v1623_v3 = vsel %vm218_vm0, %v3936_v12, 0  ;;  %v5224_v58 = vand.u32 4294901760, %v4620_v40  ;;  %v140_v48 = vpop.permute.xlu0 %139 }
 0x153   :  { %v1626_v36 = vsel %vm218_vm0, %v4517_v33, 0  ;;  %v238_v13 = vsel %vm218_vm0, %v208_v62, 0  ;;  %vm162_vm12 = vcmp.eq.s32.totalorder %v4455_v54, %v120_v47  ;;  %v1813_v41 = vand.u32 4294901760, %v1812_v0  ;;  %3376 = vmatmul.mubr.f32.vlgmr.msra.gmra.mrb[0].mxu0 %v346_v28 }
 0x154   :  { %3564 = vmatprep.mubr.f32.mxu1 %v1803_v5  ;;  %v253_v21 = vsel %vm218_vm0, %v213_v38, 0  ;;  %v4654_v17 = vsub.f32 %v232_v4, %v4635_v57  ;;  %v4656_v9 = vand.u32 4294901760, %v238_v13  ;;  %v178_v12 = vsel %vm162_vm12, 0.903125, %v5310_v61  ;;  %3400 = vmatpush3.msra.mxu0 %v5306_v20 }
 0x155   :  { %v4660_v33 = vand.u32 4294901760, %v1623_v3  ;;  %v210_v5 = vmul.f32 %v178_v12, %v4128_v18  ;;  %3565 = vmatmul.mubr.f32.gmra.mrb[10].mxu1 %v1813_v41  ;;  %v355_v28 = vsub.f32 %v4620_v40, %v5224_v58  ;;  %v4666_v39 = vand.u32 4294901760, %v1626_v36  ;;  %3425 = vmatprep.subr.mxu0 %v5306_v20 }
 0x156   :  { %5323 = vst [vmem:[#allocation53_spill] sm:$0xff] %v4654_v17  ;;  %v5227_v4 = vand.u32 4294901760, %v4539_v2  ;;  %v4671_v6 = vsub.f32 %v238_v13, %v4656_v9  ;;  %v4673_v62 = vand.u32 4294901760, %v253_v21  ;;  %v128_v18 = vpop.permute.xlu1 %127  ;;  %vm167_vm13 = vcmp.eq.s32.totalorder %v4455_v54, %v140_v48 }
 0x157   :  { %v4676_v0 = vsub.f32 %v1623_v3, %v4660_v33  ;;  %v244_v38 = vsel %vm218_vm0, %v210_v5, 0  ;;  %vm164_vm14 = vcmp.eq.s32.totalorder %v4455_v54, %v128_v18  ;;  %v356_v47 = vand.u32 4294901760, %v355_v28 }
 0x158   :  { %5324 = vst [vmem:[#allocation54_spill] sm:$0xff] %v4673_v62  ;;  %v4682_v41 = vsub.f32 %v1626_v36, %v4666_v39  ;;  %v4684_v12 = vand.u32 4294901760, %v244_v38  ;;  %v180_v46 = vsel %vm164_vm14, 0.903125, %v5310_v61  ;;  %v365_v3 = vsub.f32 %v4539_v2, %v5227_v4 }
 0x159   :  { %5325 = vst [vmem:[#allocation55_spill] sm:$0xff] %v4676_v0  ;;  %v5230_v13 = vand.u32 4294901760, %v4676_v0  ;;  %v212_v48 = vmul.f32 %v180_v46, %v4142_v22  ;;  %3378 = vmatprep.mubr.f32.mxu0 %v356_v47  ;;  %v183_v28 = vsel %vm167_vm13, 0.903125, %v5310_v61  ;;  %v1629_v36 = vsel %vm218_vm0, %v4610_v1, 0 }
 0x15a   :  { %5326 = vst [vmem:[#allocation56_spill] sm:$0xff] %v4682_v41  ;;  %v5231_v5 = vand.u32 4294901760, %v4682_v41  ;;  %v4697_v18 = vsub.f32 %v253_v21, %v4673_v62  ;;  %v366_v32 = vand.u32 4294901760, %v365_v3  ;;  %v215_v4 = vmul.f32 %v183_v28, %v4151_v26  ;;  %v136_v2 = vpop.permute.xlu1 %135 }
 0x15b   :  { %v1822_v58 = vsub.f32 %v4676_v0, %v5230_v13  ;;  %v250_v22 = vsel %vm218_vm0, %v212_v48, 0  ;;  %v4707_v47 = vand.u32 4294901760, %v1629_v36  ;;  %vm166_vm15 = vcmp.eq.s32.totalorder %v4455_v54, %v136_v2 }
 0x15c   :  { %v1832_v46 = vsub.f32 %v4682_v41, %v5231_v5  ;;  %v4710_v21 = vand.u32 4294901760, %v250_v22  ;;  %3379 = vmatmul.mubr.f32.gmra.mrb[2].mxu0 %v366_v32  ;;  %v259_v13 = vsel %vm218_vm0, %v215_v4, 0  ;;  %v182_v3 = vsel %vm166_vm15, 0.903125, %v5310_v61  ;;  %v148_v41 = vpop.permute.xlu0 %147 }
 0x15d   :  { %v1823_v1 = vand.u32 4294901760, %v1822_v58  ;;  %v4715_v26 = vsub.f32 %v244_v38, %v4684_v12  ;;  %v4718_v28 = vsub.f32 %v1629_v36, %v4707_v47  ;;  %v214_v5 = vmul.f32 %v182_v3, %v4156_v27 }
 0x15e   :  { %v1833_v48 = vand.u32 4294901760, %v1832_v46  ;;  %v4721_v2 = vand.u32 4294901760, %v259_v13  ;;  %v5238_v58 = vand.u32 4294901760, %v4654_v17  ;;  %v1632_v32 = vsel %vm218_vm0, %v4555_v50, 0  ;;  %v144_v0 = vpop.permute.xlu1 %143 }
 0x15f   :  { %5327 = vst [vmem:[#allocation57_spill] sm:$0xff] %v4718_v28  ;;  %3567 = vmatprep.mubr.f32.mxu1 %v1823_v1  ;;  %v5241_v4 = vand.u32 4294901760, %v4577_v49  ;;  %v4728_v38 = vsub.f32 %v250_v22, %v4710_v21  ;;  %v5246_v36 = vand.u32 4294901760, %v4718_v28  ;;  %v256_v27 = vsel %vm218_vm0, %v214_v5, 0 }
 0x160   :  { %5328 = vst [vmem:[#allocation58_spill] sm:$0xff] %v4721_v2  ;;  %3568 = vmatmul.mubr.f32.gmra.mrb[12].mxu1 %v1833_v48  ;;  %v4732_v46 = vand.u32 4294901760, %v1632_v32  ;;  %v4734_v1 = vand.u32 4294901760, %v256_v27  ;;  %v375_v3 = vsub.f32 %v4654_v17, %v5238_v58  ;;  %vm169_vm2 = vcmp.eq.s32.totalorder %v4455_v54, %v148_v41 }
 0x161   :  { %v385_v50 = vsub.f32 %v4577_v49, %v5241_v4  ;;  %v1842_v22 = vsub.f32 %v4718_v28, %v5246_v36  ;;  %v185_v48 = vsel %vm169_vm2, 0.903125, %v5310_v61  ;;  %vm168_vm3 = vcmp.eq.s32.totalorder %v4455_v54, %v144_v0  ;;  %v5346_v54 = vld [vmem:[#allocation56_spill] sm:$0xff] }
 0x162   :  { %5329 = vst [vmem:[#allocation59_spill] sm:$0xff] %v4734_v1  ;;  %v4747_v5 = vsub.f32 %v1632_v32, %v4732_v46  ;;  %v4752_v40 = vsub.f32 %v259_v13, %v4721_v2  ;;  %v376_v58 = vand.u32 4294901760, %v375_v3  ;;  %v217_v4 = vmul.f32 %v185_v48, %v4165_v30 }
 0x163   :  { %v386_v17 = vand.u32 4294901760, %v385_v50  ;;  %v1843_v49 = vand.u32 4294901760, %v1842_v22  ;;  %v184_v11 = vsel %vm168_vm3, 0.903125, %v5310_v61  ;;  %v5252_v36 = vand.u32 4294901760, %v4671_v6 }
 0x164   :  { %v5249_v41 = vand.u32 4294901760, %v4747_v5  ;;  %3381 = vmatprep.mubr.f32.mxu0 %v376_v58  ;;  %v265_v32 = vsel %vm218_vm0, %v217_v4, 0  ;;  %v216_v28 = vmul.f32 %v184_v11, %v4170_v31  ;;  %v5250_v0 = vand.u32 4294901760, %v4586_v8 }
 0x165   :  { %v5251_v13 = vand.u32 4294901760, %v4715_v26  ;;  %3570 = vmatprep.mubr.f32.mxu1 %v1843_v49  ;;  %v4763_v3 = vsub.f32 %v256_v27, %v4734_v1  ;;  %3382 = vmatmul.mubr.f32.gmra.mrb[4].mxu0 %v386_v17  ;;  %v395_v61 = vsub.f32 %v4671_v6, %v5252_v36  ;;  %v5259_v58 = vand.u32 4294901760, %v4644_v7 }
 0x166   :  { %v1852_v30 = vsub.f32 %v4747_v5, %v5249_v41  ;;  %v262_v31 = vsel %vm218_vm0, %v216_v28, 0  ;;  %v405_v11 = vsub.f32 %v4586_v8, %v5250_v0  ;;  %v5253_v4 = vand.u32 4294901760, %v4728_v38 }
 0x167   :  { %v415_v49 = vsub.f32 %v4715_v26, %v5251_v13  ;;  %v4780_v17 = vand.u32 4294901760, %v265_v32  ;;  %v4782_v50 = vand.u32 4294901760, %v262_v31  ;;  %v396_v22 = vand.u32 4294901760, %v395_v61 }
 0x168   :  { %v1853_v27 = vand.u32 4294901760, %v1852_v30  ;;  %v406_v48 = vand.u32 4294901760, %v405_v11  ;;  %v425_v28 = vsub.f32 %v4644_v7, %v5259_v58  ;;  %v435_v0 = vsub.f32 %v4728_v38, %v5253_v4  ;;  %v5345_v58 = vld [vmem:[#allocation53_spill] sm:$0xff] }
 0x169   :  { %5330 = vst [vmem:[#allocation60_spill] sm:$0xff] %v4780_v17  ;;  %5331 = vst [vmem:[#allocation61_spill] sm:$0xff] %v4782_v50  ;;  %v416_v41 = vand.u32 4294901760, %v415_v49  ;;  %v4791_v13 = vsub.f32 %v262_v31, %v4782_v50  ;;  %3384 = vmatprep.mubr.f32.mxu0 %v396_v22  ;;  %v5258_v30 = vand.u32 4294901760, %v4697_v18  ;;  %v5254_v36 = vand.u32 4294901760, %v4763_v3 }
 0x16a   :  { %3571 = vmatmul.mubr.f32.gmra.mrb[14].mxu1 %v1853_v27  ;;  %3385 = vmatmul.mubr.f32.gmra.mrb[6].mxu0 %v406_v48  ;;  %v436_v61 = vand.u32 4294901760, %v435_v0  ;;  %v4801_v27 = vsub.f32 %v265_v32, %v4780_v17  ;;  %v426_v31 = vand.u32 4294901760, %v425_v28  ;;  %v5257_v4 = vand.u32 4294901760, %v4752_v40 }
 0x16b   :  { %3575 = vmatprep.mubr.f32.mxu1 %v4420_v24  ;;  %3387 = vmatprep.mubr.f32.mxu0 %v416_v41  ;;  %v455_v11 = vsub.f32 %v4763_v3, %v5254_v36  ;;  %v5256_v49 = vand.u32 4294901760, %v4791_v13  ;;  %v445_v22 = vsub.f32 %v4697_v18, %v5258_v30  ;;  %v5332_v36 = vmov 1.0|1.0   ;;  %v5344_v30 = vld [vmem:[#allocation45_spill] sm:$0xff] }
 0x16c   :  { %v465_v48 = vsub.f32 %v4752_v40, %v5257_v4  ;;  %v5255_v28 = vand.u32 4294901760, %v4801_v27  ;;  %v5343_v4 = vld [vmem:[#allocation55_spill] sm:$0xff]  ;;  %vm3028_vm0 = vcmask 130112   ;;  %vm3042_vm4 = vcmask 261312  }
 0x16d   :  { %v456_v41 = vand.u32 4294901760, %v455_v11  ;;  %v475_v32 = vsub.f32 %v4791_v13, %v5256_v49  ;;  %v446_v0 = vand.u32 4294901760, %v445_v22  ;;  %v5342_v49 = vld [vmem:[#allocation51_spill] sm:$0xff]  ;;  %vm3049_vm5 = vcmask 326912  }
 0x16e   :  { %3576 = vmatmul.mubr.f32.vlgmr.msra.gmra.mrb[0].mxu1 %v4428_v52  ;;  %3388 = vmatmul.mubr.f32.gmra.mrb[8].mxu0 %v426_v31  ;;  %v466_v11 = vand.u32 4294901760, %v465_v48  ;;  %v485_v31 = vsub.f32 %v4801_v27, %v5255_v28  ;;  %v5336_v48 = vld [vmem:[#allocation47_spill] sm:$0xff]  ;;  %v5341_v28 = vld [vmem:[#allocation52_spill] sm:$0xff]  ;;  %vm3056_vm6 = vcmask 392512   ;;  %vm3063_vm7 = vcmask 458112  }
 0x16f   :  { %3578 = vmatprep.mubr.f32.mxu1 %v4441_v14  ;;  %3600 = vmatpush3.msra.mxu1 %v5306_v20  ;;  %vm3070_vm8 = vcmask 523712   ;;  %vm3077_vm9 = vcmask 589312   ;;  %vm3084_vm10 = vcmask 654912   ;;  %vm3091_vm11 = vcmask 720512  }
 0x170   :  { %3390 = vmatprep.mubr.f32.mxu0 %v436_v61  ;;  %3731 = vmatprep.subr.bf16.mxu1 %v5332_v36  ;;  %v476_v61 = vand.u32 4294901760, %v475_v32  ;;  %v486_v22 = vand.u32 4294901760, %v485_v31  ;;  %v5334_v32 = vld [vmem:[#allocation44_spill] sm:$0xff]  ;;  %v5339_v31 = vld [vmem:[#allocation50_spill] sm:$0xff]  ;;  %vm3098_vm12 = vcmask 786112   ;;  %vm3105_vm13 = vcmask 851712  }
 0x171   :  { %vm3112_vm14 = vcmask 917312   ;;  %vm3119_vm15 = vcmask 982912   ;;  %vm3126_vm2 = vcmask 1048512  }
 0x172   :  { %3579 = vmatmul.mubr.f32.gmra.mrb[2].mxu1 %v4451_v23  ;;  %3391 = vmatmul.mubr.f32.gmra.mrb[10].mxu0 %v446_v0  ;;  %v5335_v0 = vld [vmem:[#allocation46_spill] sm:$0xff] }
 0x173   :  { %3581 = vmatprep.mubr.f32.mxu1 %v4467_v45  ;;  %3393 = vmatprep.mubr.f32.mxu0 %v456_v41  ;;  %v5333_v41 = vld [vmem:[#allocation42_spill] sm:$0xff] }
 0x176   :  { %3582 = vmatmul.mubr.f32.gmra.mrb[4].mxu1 %v4487_v15  ;;  %3394 = vmatmul.mubr.f32.gmra.mrb[12].mxu0 %v466_v11  ;;  %v5338_v11 = vld [vmem:[#allocation41_spill] sm:$0xff] }
 0x177   :  { %3584 = vmatprep.mubr.f32.mxu1 %v4508_v25  ;;  %3396 = vmatprep.mubr.f32.mxu0 %v476_v61  ;;  %v5337_v61 = vld [vmem:[#allocation49_spill] sm:$0xff] }
 0x17a   :  { %3585 = vmatmul.mubr.f32.gmra.mrb[6].mxu1 %v4528_v63  ;;  %3397 = vmatmul.mubr.f32.gmra.mrb[14].mxu0 %v486_v22  ;;  %v5340_v22 = vld [vmem:[#allocation43_spill] sm:$0xff] }
 0x17b   :  { %3587 = vmatprep.mubr.f32.mxu1 %v4559_v35  ;;  %3401 = vmatprep.mubr.f32.mxu0 %v4579_v43 }
 0x17e   :  { %3588 = vmatmul.mubr.f32.gmra.mrb[8].mxu1 %v4482_v16  ;;  %3402 = vmatmul.mubr.f32.vlgmr.msra.gmra.mrb[0].mxu0 %v4496_v60 }
 0x17f   :  { %3590 = vmatprep.mubr.f32.mxu1 %v4588_v56  ;;  %3426 = vmatpush3.msra.mxu0 %v5306_v20 }
 0x180   :  { %3404 = vmatprep.mubr.f32.mxu0 %v4606_v19  ;;  %3719 = vmatprep.subr.bf16.mxu0 %v5332_v36 }
 0x182   :  { %3591 = vmatmul.mubr.f32.gmra.mrb[10].mxu1 %v4590_v51  ;;  %3405 = vmatmul.mubr.f32.gmra.mrb[2].mxu0 %v4514_v29 }
 0x183   :  { %3593 = vmatprep.mubr.f32.mxu1 %v4660_v33  ;;  %3407 = vmatprep.mubr.f32.mxu0 %v4635_v57 }
 0x186   :  { %3594 = vmatmul.mubr.f32.gmra.mrb[12].mxu1 %v4666_v39  ;;  %3408 = vmatmul.mubr.f32.gmra.mrb[4].mxu0 %v4548_v55 }
 0x187   :  { %3596 = vmatprep.mubr.f32.mxu1 %v4707_v47  ;;  %3410 = vmatprep.mubr.f32.mxu0 %v4656_v9 }
 0x18a   :  { %3597 = vmatmul.mubr.f32.gmra.mrb[14].mxu1 %v4732_v46  ;;  %3411 = vmatmul.mubr.f32.gmra.mrb[6].mxu0 %v4565_v34 }
 0x18b   :  { %3601 = vmatprep.mubr.f32.mxu1 %v4423_v59  ;;  %3413 = vmatprep.mubr.f32.mxu0 %v4684_v12 }
 0x18e   :  { %3602 = vmatmul.mubr.f32.vlgmr.msra.gmra.mrb[0].mxu1 %v4435_v10  ;;  %3414 = vmatmul.mubr.f32.gmra.mrb[8].mxu0 %v4613_v42 }
 0x18f   :  { %3604 = vmatprep.mubr.f32.mxu1 %v4447_v53  ;;  %3416 = vmatprep.mubr.f32.mxu0 %v4710_v21 }
 0x190   :  { %3732 = vmatpush3.bf16.msra.mxu1 %v5332_v36 }
 0x191   :  { %3733 = vmatprep.subr.bf16.mxu1 %v5332_v36 }
 0x192   :  { %3605 = vmatmul.mubr.f32.gmra.mrb[2].mxu1 %v4458_v44  ;;  %3417 = vmatmul.mubr.f32.gmra.mrb[10].mxu0 %v4673_v62  ;;  %v5351_v62 = vand.u32 4294901760, %v4447_v53  ;;  %v5355_v53 = vand.u32 4294901760, %v5334_v32 }
 0x193   :  { %3607 = vmatprep.mubr.f32.mxu1 %v4477_v37  ;;  %3419 = vmatprep.mubr.f32.mxu0 %v4734_v1  ;;  %v5350_v1 = vand.u32 4294901760, %v4435_v10  ;;  %v5354_v10 = vand.u32 4294901760, %v5333_v41 }
 0x194   :  { %3734 = vmatpush3.bf16.msra.mxu1 %v5332_v36 }
 0x195   :  { %3657 = vmatprep.subr.mxu1 %v5306_v20 }
 0x196   :  { %3608 = vmatmul.mubr.f32.gmra.mrb[4].mxu1 %v5333_v41  ;;  %3420 = vmatmul.mubr.f32.gmra.mrb[12].mxu0 %v4721_v2  ;;  %v5349_v2 = vand.u32 4294901760, %v4423_v59  ;;  %v5352_v59 = vand.u32 4294901760, %v4458_v44  ;;  %v5356_v44 = vand.u32 4294901760, %v5335_v0  ;;  %v5360_v41 = vand.u32 4294901760, %v5339_v31 }
 0x197   :  { %3610 = vmatprep.mubr.f32.mxu1 %v5334_v32  ;;  %3422 = vmatprep.mubr.f32.mxu0 %v4782_v50  ;;  %v5348_v50 = vld [vmem:[#allocation48_spill] sm:$0xff]  ;;  %v5361_v32 = vand.u32 4294901760, %v5340_v22 }
 0x19a   :  { %3611 = vmatmul.mubr.f32.gmra.mrb[6].mxu1 %v5335_v0  ;;  %3423 = vmatmul.mubr.f32.gmra.mrb[14].mxu0 %v4780_v17  ;;  %v5347_v17 = vld [vmem:[#allocation57_spill] sm:$0xff]  ;;  %v5362_v0 = vand.u32 4294901760, %v5341_v28 }
 0x19b   :  { %3613 = vmatprep.mubr.f32.mxu1 %v5336_v48  ;;  %3427 = vmatprep.mubr.f32.mxu0 %v5337_v61 }
 0x19e   :  { %3614 = vmatmul.mubr.f32.gmra.mrb[8].mxu1 %v5338_v11  ;;  %3428 = vmatmul.mubr.f32.vlgmr.msra.gmra.mrb[0].mxu0 %v5340_v22  ;;  %v5367_v22 = vand.u32 4294901760, %v5346_v54 }
 0x19f   :  { %3616 = vmatprep.mubr.f32.mxu1 %v5339_v31  ;;  %3720 = vmatpush3.bf16.msra.mxu0 %v5332_v36  ;;  %v5366_v31 = vand.u32 4294901760, %v5345_v58 }
 0x1a0   :  { %3430 = vmatprep.mubr.f32.mxu0 %v5341_v28  ;;  %3721 = vmatprep.subr.bf16.mxu0 %v5332_v36  ;;  %v5369_v28 = vand.u32 4294901760, %v5348_v50 }
 0x1a2   :  { %3617 = vmatmul.mubr.f32.gmra.mrb[10].mxu1 %v5342_v49  ;;  %3431 = vmatmul.mubr.f32.gmra.mrb[2].mxu0 %v5344_v30 }
 0x1a3   :  { %3619 = vmatprep.mubr.f32.mxu1 %v5343_v4  ;;  %3433 = vmatprep.mubr.f32.mxu0 %v5345_v58  ;;  %v5372_v58 = vand.u32 4294901760, %v4586_v8 }
 0x1a4   :  { %3722 = vmatpush3.bf16.msra.mxu0 %v5332_v36 }
 0x1a5   :  { %3483 = vmatprep.subr.mxu0 %v5306_v20 }
 0x1a6   :  { %3620 = vmatmul.mubr.f32.gmra.mrb[12].mxu1 %v5346_v54  ;;  %3434 = vmatmul.mubr.f32.gmra.mrb[4].mxu0 %v5348_v50  ;;  %v5373_v54 = vand.u32 4294901760, %v4715_v26 }
 0x1a7   :  { %3622 = vmatprep.mubr.f32.mxu1 %v5347_v17  ;;  %3436 = vmatprep.mubr.f32.mxu0 %v4671_v6 }
 0x1aa   :  { %3623 = vmatmul.mubr.f32.gmra.mrb[14].mxu1 %v4747_v5  ;;  %3437 = vmatmul.mubr.f32.gmra.mrb[6].mxu0 %v4586_v8  ;;  %v5376_v8 = vand.u32 4294901760, %v4697_v18 }
 0x1ab   :  { %3633 = vmatprep.mubr.f32.mxu1 %v5349_v2  ;;  %3439 = vmatprep.mubr.f32.mxu0 %v4715_v26  ;;  %v5353_v2 = vand.u32 4294901760, %v4477_v37  ;;  %v5357_v37 = vand.u32 4294901760, %v5336_v48  ;;  %v5363_v48 = vand.u32 4294901760, %v5342_v49  ;;  %v5370_v49 = vand.u32 4294901760, %v4671_v6 }
 0x1ac   :  { %v5375_v6 = vand.u32 4294901760, %v4728_v38  ;;  %v5377_v26 = vand.u32 4294901760, %v4763_v3 }
 0x1ae   :  { %3634 = vmatmul.mubr.f32.vlgmr.msra.gmra.mrb[0].mxu1 %v5350_v1  ;;  %3440 = vmatmul.mubr.f32.gmra.mrb[8].mxu0 %v4644_v7  ;;  %v5359_v1 = vand.u32 4294901760, %v5338_v11  ;;  %v5365_v11 = vand.u32 4294901760, %v5344_v30  ;;  %v5407_v30 = vld [vmem:[#allocation21_spill] sm:$0xff] }
 0x1af   :  { %3636 = vmatprep.mubr.f32.mxu1 %v5351_v62  ;;  %3442 = vmatprep.mubr.f32.mxu0 %v4728_v38  ;;  %v5358_v62 = vand.u32 4294901760, %v5337_v61  ;;  %v5364_v61 = vand.u32 4294901760, %v5343_v4  ;;  %v5371_v4 = vand.u32 4294901760, %v4747_v5  ;;  %v5379_v38 = vand.u32 4294901760, %v4791_v13  ;;  %v5404_v5 = vld [vmem:[#allocation20_spill] sm:$0xff] }
 0x1b0   :  { %3658 = vmatpush3.msra.mxu1 %v5306_v20 }
 0x1b1   :  { %3735 = vmatprep.subr.bf16.mxu1 %v5332_v36 }
 0x1b2   :  { %3637 = vmatmul.mubr.f32.gmra.mrb[2].mxu1 %v5352_v59  ;;  %3443 = vmatmul.mubr.f32.gmra.mrb[10].mxu0 %v4697_v18  ;;  %v5380_v18 = vand.u32 4294901760, %v4801_v27 }
 0x1b3   :  { %3639 = vmatprep.mubr.f32.mxu1 %v5353_v2  ;;  %3445 = vmatprep.mubr.f32.mxu0 %v4763_v3 }
 0x1b6   :  { %3640 = vmatmul.mubr.f32.gmra.mrb[4].mxu1 %v5354_v10  ;;  %3446 = vmatmul.mubr.f32.gmra.mrb[12].mxu0 %v4752_v40 }
 0x1b7   :  { %3642 = vmatprep.mubr.f32.mxu1 %v5355_v53  ;;  %3448 = vmatprep.mubr.f32.mxu0 %v4791_v13  ;;  %v5405_v13 = vld [vmem:[#allocation22_spill] sm:$0xff]  ;;  %v2713_v53 = vld [vmem:[#allocation3 + $0x8] sm:$0xff] }
 0x1b8   :  { %v5406_v3 = vsub.f32 %v5404_v5, %v5405_v13  ;;  %v2719_v5 = vld [vmem:[#allocation3 + $0x38] sm:$0xff] }
 0x1ba   :  { %3643 = vmatmul.mubr.f32.gmra.mrb[6].mxu1 %v5356_v44  ;;  %3449 = vmatmul.mubr.f32.gmra.mrb[14].mxu0 %v4801_v27  ;;  %v2758_v50 = vmul.f32 1.442695, %v5406_v3  ;;  %v5408_v27 = vld [vmem:[#allocation23_spill] sm:$0xff] }
 0x1bb   :  { %3645 = vmatprep.mubr.f32.mxu1 %v5357_v37  ;;  %3459 = vmatprep.mubr.f32.mxu0 %v5358_v62  ;;  %v5409_v59 = vsub.f32 %v5407_v30, %v5408_v27  ;;  %v2712_v37 = vld [vmem:[#allocation3] sm:$0xff]  ;;  %v2718_v30 = vld [vmem:[#allocation3 + $0x30] sm:$0xff] }
 0x1bc   :  { %v5410_v62 = vld [vmem:[#allocation24_spill] sm:$0xff]  ;;  %v5431_v27 = vld [vmem:[#allocation37_spill] sm:$0xff] }
 0x1bd   :  { %v2756_v2 = vmul.f32 1.442695, %v5409_v59  ;;  %v5432_v59 = vld [vmem:[#allocation39_spill] sm:$0xff] }
 0x1be   :  { %3646 = vmatmul.mubr.f32.gmra.mrb[8].mxu1 %v5359_v1  ;;  %3460 = vmatmul.mubr.f32.vlgmr.msra.gmra.mrb[0].mxu0 %v5361_v32  ;;  %v5411_v1 = vld [vmem:[#allocation26_spill] sm:$0xff] }
 0x1bf   :  { %3648 = vmatprep.mubr.f32.mxu1 %v5360_v41  ;;  %3484 = vmatpush3.msra.mxu0 %v5306_v20  ;;  %v5368_v20 = vand.u32 4294901760, %v5347_v17  ;;  %v5374_v17 = vand.u32 4294901760, %v4644_v7  ;;  %v5378_v7 = vand.u32 4294901760, %v4752_v40  ;;  %v5381_v40 = vld [vmem:[#allocation54_spill] sm:$0xff]  ;;  %v5412_v41 = vsub.f32 %v5410_v62, %v5411_v1 }
 0x1c0   :  { %3462 = vmatprep.mubr.f32.mxu0 %v5362_v0  ;;  %3723 = vmatprep.subr.bf16.mxu0 %v5332_v36  ;;  %v5413_v0 = vld [vmem:[#allocation25_spill] sm:$0xff] }
 0x1c1   :  { %v2762_v32 = vmul.f32 1.442695, %v5412_v41 }
 0x1c2   :  { %3649 = vmatmul.mubr.f32.gmra.mrb[10].mxu1 %v5363_v48  ;;  %3463 = vmatmul.mubr.f32.gmra.mrb[2].mxu0 %v5365_v11  ;;  %v5414_v48 = vld [vmem:[#allocation27_spill] sm:$0xff] }
 0x1c3   :  { %3651 = vmatprep.mubr.f32.mxu1 %v5364_v61  ;;  %3465 = vmatprep.mubr.f32.mxu0 %v5366_v31  ;;  %v5415_v61 = vsub.f32 %v5413_v0, %v5414_v48  ;;  %v2721_v0 = vld [vmem:[#allocation3 + $0x48] sm:$0xff] }
 0x1c5   :  { %v2760_v11 = vmul.f32 1.442695, %v5415_v61 }
 0x1c6   :  { %3652 = vmatmul.mubr.f32.gmra.mrb[12].mxu1 %v5367_v22  ;;  %3466 = vmatmul.mubr.f32.gmra.mrb[4].mxu0 %v5369_v28 }
 0x1c7   :  { %3654 = vmatprep.mubr.f32.mxu1 %v5368_v20  ;;  %3468 = vmatprep.mubr.f32.mxu0 %v5370_v49  ;;  %v2715_v49 = vld [vmem:[#allocation3 + $0x18] sm:$0xff] }
 0x1ca   :  { %3655 = vmatmul.mubr.f32.gmra.mrb[14].mxu1 %v5371_v4  ;;  %3469 = vmatmul.mubr.f32.gmra.mrb[6].mxu0 %v5372_v58 }
 0x1cb   :  { %3659 = vmatprep.mubr.f32.mxu1 %v4420_v24  ;;  %3471 = vmatprep.mubr.f32.mxu0 %v5373_v54 }
 0x1ce   :  { %3660 = vmatmul.mubr.f32.vlgmr.msra.gmra.mrb[0].mxu1 %v4428_v52  ;;  %3472 = vmatmul.mubr.f32.gmra.mrb[8].mxu0 %v5374_v17  ;;  %v2714_v17 = vld [vmem:[#allocation3 + $0x10] sm:$0xff] }
 0x1cf   :  { %3662 = vmatprep.mubr.f32.mxu1 %v4441_v14  ;;  %3474 = vmatprep.mubr.f32.mxu0 %v5375_v6  ;;  %v5416_v6 = vld [vmem:[#allocation28_spill] sm:$0xff] }
 0x1d0   :  { %3736 = vmatpush3.bf16.msra.mxu1 %v5332_v36 }
 0x1d1   :  { %3737 = vmatprep.subr.bf16.mxu1 %v5332_v36 }
 0x1d2   :  { %3663 = vmatmul.mubr.f32.gmra.mrb[2].mxu1 %v4451_v23  ;;  %3475 = vmatmul.mubr.f32.gmra.mrb[10].mxu0 %v5376_v8  ;;  %v5417_v8 = vld [vmem:[#allocation30_spill] sm:$0xff] }
 0x1d3   :  { %3665 = vmatprep.mubr.f32.mxu1 %v4467_v45  ;;  %3477 = vmatprep.mubr.f32.mxu0 %v5377_v26  ;;  %v5418_v26 = vsub.f32 %v5416_v6, %v5417_v8  ;;  %v2723_v6 = vld [vmem:[#allocation3 + $0x58] sm:$0xff]  ;;  %v186_v8 = vld [vmem:[#allocation4] sm:$0xff] }
 0x1d4   :  { %3738 = vmatpush3.bf16.msra.mxu1 %v5332_v36 }
 0x1d6   :  { %3666 = vmatmul.mubr.f32.gmra.mrb[4].mxu1 %v4487_v15  ;;  %3478 = vmatmul.mubr.f32.gmra.mrb[12].mxu0 %v5378_v7  ;;  %v2766_v7 = vmul.f32 1.442695, %v5418_v26 }
 0x1d7   :  { %3668 = vmatprep.mubr.f32.mxu1 %v4508_v25  ;;  %3480 = vmatprep.mubr.f32.mxu0 %v5379_v38 }
 0x1da   :  { %3669 = vmatmul.mubr.f32.gmra.mrb[6].mxu1 %v4528_v63  ;;  %3481 = vmatmul.mubr.f32.gmra.mrb[14].mxu0 %v5380_v18  ;;  %v5419_v18 = vld [vmem:[#allocation29_spill] sm:$0xff] }
 0x1db   :  { %3671 = vmatprep.mubr.f32.mxu1 %v4559_v35  ;;  %3485 = vmatprep.mubr.f32.mxu0 %v4579_v43 }
 0x1de   :  { %3672 = vmatmul.mubr.f32.gmra.mrb[8].mxu1 %v4482_v16  ;;  %3486 = vmatmul.mubr.f32.vlgmr.msra.gmra.mrb[0].mxu0 %v4496_v60 }
 0x1df   :  { %3674 = vmatprep.mubr.f32.mxu1 %v4588_v56  ;;  %3724 = vmatpush3.bf16.msra.mxu0 %v5332_v36 }
 0x1e0   :  { %3488 = vmatprep.mubr.f32.mxu0 %v4606_v19  ;;  %3725 = vmatprep.subr.bf16.mxu0 %v5332_v36 }
 0x1e2   :  { %3675 = vmatmul.mubr.f32.gmra.mrb[10].mxu1 %v4590_v51  ;;  %3489 = vmatmul.mubr.f32.gmra.mrb[2].mxu0 %v4514_v29 }
 0x1e3   :  { %3677 = vmatprep.mubr.f32.mxu1 %v4660_v33  ;;  %3491 = vmatprep.mubr.f32.mxu0 %v4635_v57 }
 0x1e4   :  { %3726 = vmatpush3.bf16.msra.mxu0 %v5332_v36  ;;  %v5382_v36 = vld [vmem:[#allocation59_spill] sm:$0xff] }
 0x1e6   :  { %3678 = vmatmul.mubr.f32.gmra.mrb[12].mxu1 %v4666_v39  ;;  %3492 = vmatmul.mubr.f32.gmra.mrb[4].mxu0 %v4548_v55 }
 0x1e7   :  { %3680 = vmatprep.mubr.f32.mxu1 %v4707_v47  ;;  %3494 = vmatprep.mubr.f32.mxu0 %v4656_v9 }
 0x1ea   :  { %3681 = vmatmul.mubr.f32.gmra.mrb[14].mxu1 %v4732_v46  ;;  %3495 = vmatmul.mubr.f32.gmra.mrb[6].mxu0 %v4565_v34 }
 0x1eb   :  { %3691 = vmatprep.mubr.f32.mxu1 %v4420_v24  ;;  %3497 = vmatprep.mubr.f32.mxu0 %v4684_v12  ;;  %v5383_v24 = vld [vmem:[#allocation58_spill] sm:$0xff] }
 0x1ee   :  { %3692 = vmatmul.mubr.f32.vlgmr.msra.gmra.mrb[0].mxu1 %v4428_v52  ;;  %3498 = vmatmul.mubr.f32.gmra.mrb[8].mxu0 %v4613_v42  ;;  %v5384_v52 = vld [vmem:[#allocation61_spill] sm:$0xff] }
 0x1ef   :  { %3694 = vmatprep.mubr.f32.mxu1 %v4441_v14  ;;  %3500 = vmatprep.mubr.f32.mxu0 %v4710_v21  ;;  %v5385_v14 = vld [vmem:[#allocation60_spill] sm:$0xff] }
 0x1f2   :  { %3695 = vmatmul.mubr.f32.gmra.mrb[2].mxu1 %v4451_v23  ;;  %3501 = vmatmul.mubr.f32.gmra.mrb[10].mxu0 %v5381_v40  ;;  %v5390_v23 = vld [vmem:[#allocation11_spill] sm:$0xff] }
 0x1f3   :  { %3697 = vmatprep.mubr.f32.mxu1 %v4467_v45  ;;  %3503 = vmatprep.mubr.f32.mxu0 %v5382_v36  ;;  %v5392_v45 = vld [vmem:[#allocation12_spill] sm:$0xff] }
 0x1f6   :  { %3698 = vmatmul.mubr.f32.gmra.mrb[4].mxu1 %v4487_v15  ;;  %3504 = vmatmul.mubr.f32.gmra.mrb[12].mxu0 %v5383_v24 }
 0x1f7   :  { %3700 = vmatprep.mubr.f32.mxu1 %v4508_v25  ;;  %3506 = vmatprep.mubr.f32.mxu0 %v5384_v52 }
 0x1fa   :  { %3701 = vmatmul.mubr.f32.gmra.mrb[6].mxu1 %v4528_v63  ;;  %3507 = vmatmul.mubr.f32.gmra.mrb[14].mxu0 %v5385_v14 }
 0x1fb   :  { %3703 = vmatprep.mubr.f32.mxu1 %v4559_v35  ;;  %3517 = vmatprep.mubr.f32.mxu0 %v4579_v43  ;;  %v5386_v35 = vld [vmem:[#allocation13_spill] sm:$0xff]  ;;  %v5396_v43 = vld [vmem:[#allocation10_spill] sm:$0xff] }
 0x1fe   :  { %3704 = vmatmul.mubr.f32.gmra.mrb[8].mxu1 %v4482_v16  ;;  %3518 = vmatmul.mubr.f32.vlgmr.msra.gmra.mrb[0].mxu0 %v4496_v60  ;;  %v5389_v16 = vld [vmem:[#allocation9_spill] sm:$0xff]  ;;  %v5393_v60 = vld [vmem:[#allocation14_spill] sm:$0xff] }
 0x1ff   :  { %3706 = vmatprep.mubr.f32.mxu1 %v4588_v56  ;;  %3520 = vmatprep.mubr.f32.mxu0 %v4606_v19  ;;  %v5391_v25 = vsub.f32 %v5389_v16, %v5390_v23  ;;  %v5398_v19 = vld [vmem:[#allocation16_spill] sm:$0xff] }
 0x202   :  { %3707 = vmatmul.mubr.f32.gmra.mrb[10].mxu1 %v4590_v51  ;;  %3521 = vmatmul.mubr.f32.gmra.mrb[2].mxu0 %v4514_v29  ;;  %v5394_v29 = vsub.f32 %v5392_v45, %v5393_v60  ;;  %v5425_v45 = vld [vmem:[#allocation33_spill] sm:$0xff]  ;;  %v5426_v60 = vld [vmem:[#allocation35_spill] sm:$0xff] }
 0x203   :  { %3709 = vmatprep.mubr.f32.mxu1 %v4660_v33  ;;  %3523 = vmatprep.mubr.f32.mxu0 %v4635_v57  ;;  %v5395_v57 = vld [vmem:[#allocation8_spill] sm:$0xff] }
 0x204   :  { %v5397_v56 = vsub.f32 %v5395_v57, %v5396_v43 }
 0x206   :  { %3710 = vmatmul.mubr.f32.gmra.mrb[12].mxu1 %v4666_v39  ;;  %3524 = vmatmul.mubr.f32.gmra.mrb[4].mxu0 %v4548_v55  ;;  %v5387_v55 = vld [vmem:[#allocation15_spill] sm:$0xff]  ;;  %v2748_v51 = vmul.f32 1.442695, %v5397_v56 }
 0x207   :  { %3712 = vmatprep.mubr.f32.mxu1 %v4707_v47  ;;  %3526 = vmatprep.mubr.f32.mxu0 %v4656_v9  ;;  %v5388_v63 = vsub.f32 %v5386_v35, %v5387_v55  ;;  %v5399_v9 = vld [vmem:[#allocation18_spill] sm:$0xff]  ;;  %v5402_v47 = vld [vmem:[#allocation19_spill] sm:$0xff]  ;;  %v5422_v35 = vld [vmem:[#allocation32_spill] sm:$0xff] }
 0x208   :  { %v5400_v33 = vsub.f32 %v5398_v19, %v5399_v9  ;;  %v5423_v55 = vld [vmem:[#allocation34_spill] sm:$0xff]  ;;  %v2716_v56 = vld [vmem:[#allocation3 + $0x20] sm:$0xff] }
 0x209   :  { %v2746_v15 = vmul.f32 1.442695, %v5388_v63  ;;  %v5424_v63 = vsub.f32 %v5422_v35, %v5423_v55  ;;  %v5429_v19 = vld [vmem:[#allocation38_spill] sm:$0xff] }
 0x20a   :  { %3713 = vmatmul.mubr.f32.gmra.mrb[14].mxu1 %v4732_v46  ;;  %3527 = vmatmul.mubr.f32.gmra.mrb[6].mxu0 %v4565_v34  ;;  %v2750_v34 = vmul.f32 1.442695, %v5394_v29  ;;  %v2754_v39 = vmul.f32 1.442695, %v5400_v33  ;;  %v5427_v29 = vsub.f32 %v5425_v45, %v5426_v60  ;;  %v2725_v60 = vld [vmem:[#allocation3 + $0x68] sm:$0xff] }
 0x20b   :  { %3529 = vmatprep.mubr.f32.mxu0 %v4684_v12  ;;  %3939 = vpow2.f32 %v2746_v15  ;;  %v5401_v12 = vld [vmem:[#allocation17_spill] sm:$0xff]  ;;  %v2770_v15 = vmul.f32 1.442695, %v5424_v63 }
 0x20e   :  { %3530 = vmatmul.mubr.f32.gmra.mrb[8].mxu0 %v4613_v42  ;;  %v2744_v42 = vmul.f32 1.442695, %v5391_v25  ;;  %v2717_v25 = vld [vmem:[#allocation3 + $0x28] sm:$0xff] }
 0x20f   :  { %3532 = vmatprep.mubr.f32.mxu0 %v4710_v21  ;;  %v5403_v21 = vsub.f32 %v5401_v12, %v5402_v47 }
 0x210   :  { %3941 = vpow2.f32 %v2744_v42 }
 0x211   :  { %3943 = vpow2.f32 %v2750_v34  ;;  %v2752_v46 = vmul.f32 1.442695, %v5403_v21  ;;  %v2768_v34 = vmul.f32 1.442695, %v5427_v29  ;;  %v188_v29 = vld [vmem:[#allocation4 + $0x10] sm:$0xff] }
 0x212   :  { %3533 = vmatmul.mubr.f32.gmra.mrb[10].mxu0 %v5381_v40  ;;  %3945 = vpow2.f32 %v2748_v51  ;;  %v5420_v40 = vld [vmem:[#allocation31_spill] sm:$0xff]  ;;  %v5428_v51 = vld [vmem:[#allocation36_spill] sm:$0xff] }
 0x213   :  { %3535 = vmatprep.mubr.f32.mxu0 %v5382_v36  ;;  %3947 = vpow2.f32 %v2754_v39  ;;  %v5421_v36 = vsub.f32 %v5419_v18, %v5420_v40  ;;  %v5430_v9 = vsub.f32 %v5428_v51, %v5429_v19  ;;  %v2722_v40 = vld [vmem:[#allocation3 + $0x50] sm:$0xff]  ;;  %v2724_v51 = vld [vmem:[#allocation3 + $0x60] sm:$0xff] }
 0x214   :  { %3949 = vpow2.f32 %v2752_v46 }
 0x215   :  { %v3940_v10 = vpop.eup %3939  ;;  %3951 = vpow2.f32 %v2758_v50  ;;  %v2774_v33 = vmul.f32 1.442695, %v5430_v9 }
 0x216   :  { %3536 = vmatmul.mubr.f32.gmra.mrb[12].mxu0 %v5383_v24  ;;  %3953 = vpow2.f32 %v2756_v2  ;;  %v2777_v31 = vmul.f32 %v3940_v10, %v2713_v53  ;;  %v2764_v24 = vmul.f32 1.442695, %v5421_v36  ;;  %v5433_v2 = vsub.f32 %v5431_v27, %v5432_v59 }
 0x217   :  { %3538 = vmatprep.mubr.f32.mxu0 %v5384_v52  ;;  %3955 = vpow2.f32 %v2762_v32 }
 0x218   :  { %3957 = vpow2.f32 %v2760_v11  ;;  %v2772_v10 = vmul.f32 1.442695, %v5433_v2  ;;  %v190_v2 = vld [vmem:[#allocation4 + $0x20] sm:$0xff] }
 0x219   :  { %3959 = vpow2.f32 %v2766_v7 }
 0x21a   :  { %3539 = vmatmul.mubr.f32.gmra.mrb[14].mxu0 %v5385_v14  ;;  %v3942_v44 = vpop.eup %3941  ;;  %3961 = vpow2.f32 %v2764_v24 }
 0x21b   :  { %v3944_v22 = vpop.eup %3943  ;;  %v2776_v28 = vmul.f32 %v3942_v44, %v2712_v37  ;;  %3963 = vpow2.f32 %v2770_v15 }
 0x21c   :  { %v3946_v4 = vpop.eup %3945  ;;  %v2779_v52 = vmul.f32 %v3944_v22, %v2715_v49  ;;  %3965 = vpow2.f32 %v2768_v34  ;;  %v187_v49 = vld [vmem:[#allocation4 + $0x8] sm:$0xff] }
 0x21d   :  { %v3948_v14 = vpop.eup %3947  ;;  %v2778_v23 = vmul.f32 %v3946_v4, %v2714_v17  ;;  %3967 = vpow2.f32 %v2774_v33 }
 0x21e   :  { %v3950_v42 = vpop.eup %3949  ;;  %v2781_v12 = vmul.f32 %v3948_v14, %v2717_v25 }
 0x21f   :  { %v3952_v47 = vpop.eup %3951  ;;  %v2780_v46 = vmul.f32 %v3950_v42, %v2716_v56 }
 0x220   :  { %v3954_v13 = vpop.eup %3953  ;;  %v2783_v37 = vmul.f32 %v3952_v47, %v2719_v5 }
 0x221   :  { %v3956_v1 = vpop.eup %3955  ;;  %v2782_v32 = vmul.f32 %v3954_v13, %v2718_v30  ;;  %v191_v13 = vld [vmem:[#allocation4 + $0x28] sm:$0xff] }
 0x222   :  { %v3958_v48 = vpop.eup %3957 }
 0x2c1   :  { %v3693_v20 = vpop.f32.mrb[0].mxu1 }
 0x2c2   :  { %v2793_v58 = vadd.f32 %v3693_v20, %v2777_v31  ;;  %v2618_v54 = vpop.f32.mrb[1].mxu1  ;;  %v2720_v31 = vld [vmem:[#allocation3 + $0x40] sm:$0xff] }
 0x2c3   :  { %v2792_v38 = vadd.f32 %v2776_v28, %v2618_v54  ;;  %v2785_v28 = vmul.f32 %v3956_v1, %v2721_v0  ;;  %v2784_v17 = vmul.f32 %v3958_v48, %v2720_v31  ;;  %v2726_v1 = vld [vmem:[#allocation3 + $0x70] sm:$0xff]  ;;  %v2843_v31 = vld [vmem:[#allocation2] sm:$0xff] }
 0x2c4   :  { %2809 = vst.msk [vmem:[#allocation3 + $0x8] sm:$0xff] %vm16_vm1, %v2793_v58  ;;  %v3960_v58 = vpop.eup %3959 }
 0x2c5   :  { %2808 = vst.msk [vmem:[#allocation3] sm:$0xff] %vm16_vm1, %v2792_v38  ;;  %v3696_v16 = vpop.f32.mrb[2].mxu1  ;;  %v3962_v26 = vpop.eup %3961  ;;  %v2787_v63 = vmul.f32 %v3960_v58, %v2723_v6 }
 0x2c6   :  { %v2795_v57 = vadd.f32 %v3696_v16, %v2779_v52  ;;  %v2630_v43 = vpop.f32.mrb[3].mxu1  ;;  %v3964_v36 = vpop.eup %3963  ;;  %v189_v16 = vld [vmem:[#allocation4 + $0x18] sm:$0xff]  ;;  %v2786_v45 = vmul.f32 %v3962_v26, %v2722_v40 }
 0x2c7   :  { %v2794_v39 = vadd.f32 %v2778_v23, %v2630_v43  ;;  %v3966_v55 = vpop.eup %3965 }
 0x2c8   :  { %2811 = vst.msk [vmem:[#allocation3 + $0x18] sm:$0xff] %vm16_vm1, %v2795_v57  ;;  %v3968_v25 = vpop.eup %3967  ;;  %v2788_v59 = vmul.f32 %v3966_v55, %v2724_v51  ;;  %v194_v51 = vld [vmem:[#allocation4 + $0x40] sm:$0xff] }
 0x2c9   :  { %2810 = vst.msk [vmem:[#allocation3 + $0x10] sm:$0xff] %vm16_vm1, %v2794_v39  ;;  %v3699_v21 = vpop.f32.mrb[4].mxu1 }
 0x2ca   :  { %v2797_v3 = vadd.f32 %v3699_v21, %v2781_v12  ;;  %v2642_v50 = vpop.f32.mrb[5].mxu1  ;;  %v2727_v12 = vld [vmem:[#allocation3 + $0x78] sm:$0xff] }
 0x2cb   :  { %v2796_v53 = vadd.f32 %v2780_v46, %v2642_v50  ;;  %v2860_v44 = vld [vmem:[#allocation3 + $0x8] sm:$0xff]  ;;  %v2789_v46 = vmul.f32 %v3964_v36, %v2725_v60 }
 0x2cc   :  { %2813 = vst.msk [vmem:[#allocation3 + $0x28] sm:$0xff] %vm16_vm1, %v2797_v3  ;;  %3969 = vlog2.f32 %v2860_v44  ;;  %v2859_v62 = vld [vmem:[#allocation3] sm:$0xff]  ;;  %v195_v60 = vld [vmem:[#allocation4 + $0x48] sm:$0xff] }
 0x2cd   :  { %2812 = vst.msk [vmem:[#allocation3 + $0x20] sm:$0xff] %vm16_vm1, %v2796_v53  ;;  %v3702_v41 = vpop.f32.mrb[6].mxu1  ;;  %3971 = vlog2.f32 %v2859_v62 }
 0x2ce   :  { %v2799_v61 = vadd.f32 %v3702_v41, %v2783_v37  ;;  %v2654_v11 = vpop.f32.mrb[7].mxu1  ;;  %3973 = vpow2.f32 %v2772_v10  ;;  %v2791_v37 = vmul.f32 %v3968_v25, %v2727_v12  ;;  %v2844_v41 = vld [vmem:[#allocation2 + $0x8] sm:$0xff] }
 0x2cf   :  { %v2798_v22 = vadd.f32 %v2782_v32, %v2654_v11  ;;  %v2862_v20 = vld [vmem:[#allocation3 + $0x18] sm:$0xff]  ;;  %v2848_v12 = vld [vmem:[#allocation2 + $0x28] sm:$0xff] }
 0x2d0   :  { %2815 = vst.msk [vmem:[#allocation3 + $0x38] sm:$0xff] %vm16_vm1, %v2799_v61  ;;  %3975 = vlog2.f32 %v2862_v20  ;;  %v2861_v4 = vld [vmem:[#allocation3 + $0x10] sm:$0xff] }
 0x2d1   :  { %2814 = vst.msk [vmem:[#allocation3 + $0x30] sm:$0xff] %vm16_vm1, %v2798_v22  ;;  %v3705_v54 = vpop.f32.mrb[8].mxu1  ;;  %3977 = vlog2.f32 %v2861_v4  ;;  %v3519_v18 = vpop.f32.mrb[0].mxu0 }
 0x2d2   :  { %v2801_v7 = vadd.f32 %v3705_v54, %v2785_v28  ;;  %v2666_v38 = vpop.f32.mrb[9].mxu1  ;;  %v1346_v52 = vadd.f32 %v3519_v18, %v187_v49  ;;  %v1251_v14 = vpop.f32.mrb[1].mxu0  ;;  %v193_v49 = vld [vmem:[#allocation4 + $0x38] sm:$0xff] }
 0x2d3   :  { %v2800_v24 = vadd.f32 %v2784_v17, %v2666_v38  ;;  %v2864_v35 = vld [vmem:[#allocation3 + $0x28] sm:$0xff]  ;;  %v1345_v15 = vadd.f32 %v1251_v14, %v186_v8  ;;  %v2846_v14 = vld [vmem:[#allocation2 + $0x18] sm:$0xff] }
 0x2d4   :  { %2817 = vst.msk [vmem:[#allocation3 + $0x48] sm:$0xff] %vm16_vm1, %v2801_v7  ;;  %3979 = vlog2.f32 %v2864_v35  ;;  %v2863_v23 = vld [vmem:[#allocation3 + $0x20] sm:$0xff]  ;;  %1363 = vst.msk [vmem:[#allocation4 + $0x8] sm:$0xff] %vm16_vm1, %v1346_v52  ;;  %v192_v7 = vld [vmem:[#allocation4 + $0x30] sm:$0xff] }
 0x2d5   :  { %2816 = vst.msk [vmem:[#allocation3 + $0x40] sm:$0xff] %vm16_vm1, %v2800_v24  ;;  %v3708_v42 = vpop.f32.mrb[10].mxu1  ;;  %3981 = vlog2.f32 %v2863_v23  ;;  %1362 = vst.msk [vmem:[#allocation4] sm:$0xff] %vm16_vm1, %v1345_v15  ;;  %v3522_v56 = vpop.f32.mrb[2].mxu0  ;;  %v2845_v23 = vld [vmem:[#allocation2 + $0x10] sm:$0xff] }
 0x2d6   :  { %v3970_v34 = vpop.eup %3969  ;;  %v2803_v57 = vadd.f32 %v3708_v42, %v2787_v63  ;;  %v2678_v43 = vpop.f32.mrb[11].mxu1  ;;  %v1348_v33 = vadd.f32 %v3522_v56, %v189_v16 }
 0x2d7   :  { %v3972_v19 = vpop.eup %3971  ;;  %v2802_v9 = vadd.f32 %v2786_v45, %v2678_v43  ;;  %v1263_v39 = vpop.f32.mrb[3].mxu0  ;;  %v2878_v47 = vmul.f32 0.6931472, %v3970_v34  ;;  %v2866_v21 = vld [vmem:[#allocation3 + $0x38] sm:$0xff] }
 0x2d8   :  { %2819 = vst.msk [vmem:[#allocation3 + $0x58] sm:$0xff] %vm16_vm1, %v2803_v57  ;;  %v1347_v5 = vadd.f32 %v1263_v39, %v188_v29  ;;  %v2876_v3 = vmul.f32 0.6931472, %v3972_v19  ;;  %3983 = vlog2.f32 %v2866_v21  ;;  %v2865_v50 = vld [vmem:[#allocation3 + $0x30] sm:$0xff]  ;;  %v3974_v30 = vpop.eup %3973  ;;  %1365 = vst.msk [vmem:[#allocation4 + $0x18] sm:$0xff] %vm16_vm1, %v1348_v33 }
 0x2d9   :  { %2818 = vst.msk [vmem:[#allocation3 + $0x50] sm:$0xff] %vm16_vm1, %v2802_v9  ;;  %v3711_v27 = vpop.f32.mrb[12].mxu1  ;;  %3985 = vlog2.f32 %v2865_v50  ;;  %v3525_v62 = vpop.f32.mrb[4].mxu0  ;;  %v2908_v11 = vadd.f32 %v2878_v47, %v2844_v41  ;;  %v2790_v8 = vmul.f32 %v3974_v30, %v2726_v1 }
 0x2da   :  { %v3976_v10 = vpop.eup %3975  ;;  %v2805_v53 = vadd.f32 %v3711_v27, %v2789_v46  ;;  %v2690_v44 = vpop.f32.mrb[13].mxu1  ;;  %1364 = vst.msk [vmem:[#allocation4 + $0x10] sm:$0xff] %vm16_vm1, %v1347_v5  ;;  %v1350_v48 = vadd.f32 %v3525_v62, %v191_v13  ;;  %v2907_v58 = vadd.f32 %v2876_v3, %v2843_v31  ;;  %v2847_v13 = vld [vmem:[#allocation2 + $0x20] sm:$0xff]  ;;  %v197_v27 = vld [vmem:[#allocation4 + $0x58] sm:$0xff] }
 0x2db   :  { %v3978_v32 = vpop.eup %3977  ;;  %v2804_v0 = vadd.f32 %v2788_v59, %v2690_v44  ;;  %v1275_v61 = vpop.f32.mrb[5].mxu0  ;;  %v2882_v22 = vmul.f32 0.6931472, %v3976_v10  ;;  %v2868_v20 = vld [vmem:[#allocation3 + $0x48] sm:$0xff] }
 0x2dc   :  { %2821 = vst.msk [vmem:[#allocation3 + $0x68] sm:$0xff] %vm16_vm1, %v2805_v53  ;;  %v1349_v28 = vadd.f32 %v1275_v61, %v190_v2  ;;  %v2924_v4 = vld [vmem:[#allocation4 + $0x8] sm:$0xff]  ;;  %v2880_v54 = vmul.f32 0.6931472, %v3978_v32  ;;  %3987 = vlog2.f32 %v2868_v20  ;;  %v2867_v17 = vld [vmem:[#allocation3 + $0x40] sm:$0xff]  ;;  %1367 = vst.msk [vmem:[#allocation4 + $0x28] sm:$0xff] %vm16_vm1, %v1350_v48 }
 0x2dd   :  { %2820 = vst.msk [vmem:[#allocation3 + $0x60] sm:$0xff] %vm16_vm1, %v2804_v0  ;;  %v3714_v6 = vpop.f32.mrb[14].mxu1  ;;  %v2940_v26 = vsub.f32 %v2908_v11, %v2924_v4  ;;  %v2923_v38 = vld [vmem:[#allocation4] sm:$0xff]  ;;  %3989 = vlog2.f32 %v2867_v17  ;;  %v3528_v24 = vpop.f32.mrb[6].mxu0  ;;  %v2910_v16 = vadd.f32 %v2882_v22, %v2846_v14  ;;  %v2850_v0 = vld [vmem:[#allocation2 + $0x38] sm:$0xff]  ;;  %v2849_v22 = vld [vmem:[#allocation2 + $0x30] sm:$0xff] }
 0x2de   :  { %v3980_v18 = vpop.eup %3979  ;;  %v2807_v40 = vadd.f32 %v3714_v6, %v2791_v37  ;;  %v2702_v36 = vpop.f32.mrb[15].mxu1  ;;  %1366 = vst.msk [vmem:[#allocation4 + $0x20] sm:$0xff] %vm16_vm1, %v1349_v28  ;;  %v2939_v52 = vsub.f32 %v2907_v58, %v2923_v38  ;;  %v1352_v63 = vadd.f32 %v3528_v24, %v193_v49  ;;  %v2909_v34 = vadd.f32 %v2880_v54, %v2845_v23  ;;  %v196_v37 = vld [vmem:[#allocation4 + $0x50] sm:$0xff]  ;;  %v199_v4 = vld [vmem:[#allocation4 + $0x68] sm:$0xff] }
 0x2df   :  { %v3982_v35 = vpop.eup %3981  ;;  %v2806_v55 = vadd.f32 %v2790_v8, %v2702_v36  ;;  %2975 = vperm.xlu0 %3905, %v2940_v26   ;;  %v1287_v15 = vpop.f32.mrb[7].mxu0  ;;  %v2886_v25 = vmul.f32 0.6931472, %v3980_v18  ;;  %v2870_v42 = vld [vmem:[#allocation3 + $0x58] sm:$0xff]  ;;  %v198_v26 = vld [vmem:[#allocation4 + $0x60] sm:$0xff]  ;;  %v2852_v36 = vld [vmem:[#allocation2 + $0x48] sm:$0xff] }
 0x2e0   :  { %2823 = vst.msk [vmem:[#allocation3 + $0x78] sm:$0xff] %vm16_vm1, %v2807_v40  ;;  %v1351_v45 = vadd.f32 %v1287_v15, %v192_v7  ;;  %2972 = vperm.xlu1 %3906, %v2939_v52   ;;  %v2926_v29 = vld [vmem:[#allocation4 + $0x18] sm:$0xff]  ;;  %v2884_v57 = vmul.f32 0.6931472, %v3982_v35  ;;  %3991 = vlog2.f32 %v2870_v42  ;;  %v2869_v43 = vld [vmem:[#allocation3 + $0x50] sm:$0xff]  ;;  %1369 = vst.msk [vmem:[#allocation4 + $0x38] sm:$0xff] %vm16_vm1, %v1352_v63 }
 0x2e1   :  { %2822 = vst.msk [vmem:[#allocation3 + $0x70] sm:$0xff] %vm16_vm1, %v2806_v55  ;;  %v2942_v56 = vsub.f32 %v2910_v16, %v2926_v29  ;;  %v2925_v19 = vld [vmem:[#allocation4 + $0x10] sm:$0xff]  ;;  %3993 = vlog2.f32 %v2869_v43  ;;  %v3531_v33 = vpop.f32.mrb[8].mxu0  ;;  %v2912_v5 = vadd.f32 %v2886_v25, %v2848_v12  ;;  %v2851_v55 = vld [vmem:[#allocation2 + $0x40] sm:$0xff]  ;;  %v201_v16 = vld [vmem:[#allocation4 + $0x78] sm:$0xff] }
 0x2e2   :  { %v3984_v9 = vpop.eup %3983  ;;  %1368 = vst.msk [vmem:[#allocation4 + $0x30] sm:$0xff] %vm16_vm1, %v1351_v45  ;;  %v2941_v39 = vsub.f32 %v2909_v34, %v2925_v19  ;;  %v1354_v21 = vadd.f32 %v3531_v33, %v195_v60  ;;  %v1299_v46 = vpop.f32.mrb[9].mxu0  ;;  %v2911_v2 = vadd.f32 %v2884_v57, %v2847_v13  ;;  %v200_v60 = vld [vmem:[#allocation4 + $0x70] sm:$0xff] }
 0x2e3   :  { %v3986_v47 = vpop.eup %3985  ;;  %2981 = vperm.xlu0 %3905, %v2942_v56   ;;  %v2890_v3 = vmul.f32 0.6931472, %v3984_v9  ;;  %v2872_v50 = vld [vmem:[#allocation3 + $0x68] sm:$0xff]  ;;  %v1353_v30 = vadd.f32 %v1299_v46, %v194_v51  ;;  %v2854_v56 = vld [vmem:[#allocation2 + $0x58] sm:$0xff] }
 0x2e4   :  { %2978 = vperm.xlu1 %3906, %v2941_v39   ;;  %v2928_v59 = vld [vmem:[#allocation4 + $0x28] sm:$0xff]  ;;  %v2888_v10 = vmul.f32 0.6931472, %v3986_v47  ;;  %3995 = vlog2.f32 %v2872_v50  ;;  %v2871_v53 = vld [vmem:[#allocation3 + $0x60] sm:$0xff]  ;;  %1371 = vst.msk [vmem:[#allocation4 + $0x48] sm:$0xff] %vm16_vm1, %v1354_v21  ;;  %v2853_v39 = vld [vmem:[#allocation2 + $0x50] sm:$0xff] }
 0x2e5   :  { %v2944_v44 = vsub.f32 %v2912_v5, %v2928_v59  ;;  %v2927_v62 = vld [vmem:[#allocation4 + $0x20] sm:$0xff]  ;;  %3997 = vlog2.f32 %v2871_v53  ;;  %1370 = vst.msk [vmem:[#allocation4 + $0x40] sm:$0xff] %vm16_vm1, %v1353_v30  ;;  %v3534_v41 = vpop.f32.mrb[10].mxu0  ;;  %v2914_v31 = vadd.f32 %v2890_v3, %v2850_v0  ;;  %v2858_v0 = vld [vmem:[#allocation2 + $0x78] sm:$0xff] }
 0x2e6   :  { %v3988_v1 = vpop.eup %3987  ;;  %v2943_v32 = vsub.f32 %v2911_v2, %v2927_v62  ;;  %v1356_v61 = vadd.f32 %v3534_v41, %v197_v27  ;;  %v1311_v11 = vpop.f32.mrb[11].mxu0  ;;  %v2913_v54 = vadd.f32 %v2888_v10, %v2849_v22  ;;  %v2856_v27 = vld [vmem:[#allocation2 + $0x68] sm:$0xff]  ;;  %v2855_v10 = vld [vmem:[#allocation2 + $0x60] sm:$0xff] }
 0x2e7   :  { %v3990_v48 = vpop.eup %3989  ;;  %2987 = vperm.xlu0 %3905, %v2944_v44   ;;  %v2894_v20 = vmul.f32 0.6931472, %v3988_v1  ;;  %v2874_v28 = vld [vmem:[#allocation3 + $0x78] sm:$0xff]  ;;  %v1355_v49 = vadd.f32 %v1311_v11, %v196_v37 }
 0x2e8   :  { %2984 = vperm.xlu1 %3906, %v2943_v32   ;;  %v2930_v58 = vld [vmem:[#allocation4 + $0x38] sm:$0xff]  ;;  %v2892_v17 = vmul.f32 0.6931472, %v3990_v48  ;;  %3999 = vlog2.f32 %v2874_v28  ;;  %v2873_v6 = vld [vmem:[#allocation3 + $0x70] sm:$0xff]  ;;  %1373 = vst.msk [vmem:[#allocation4 + $0x58] sm:$0xff] %vm16_vm1, %v1356_v61 }
 0x2e9   :  { %v2946_v8 = vsub.f32 %v2914_v31, %v2930_v58  ;;  %v2929_v7 = vld [vmem:[#allocation4 + $0x30] sm:$0xff]  ;;  %4001 = vlog2.f32 %v2873_v6  ;;  %1372 = vst.msk [vmem:[#allocation4 + $0x50] sm:$0xff] %vm16_vm1, %v1355_v49  ;;  %v3537_v18 = vpop.f32.mrb[12].mxu0  ;;  %v2916_v35 = vadd.f32 %v2894_v20, %v2852_v36  ;;  %v5434_v49 = vlaneseq  ;;  %v5435_v58 = vld [vmem:[#allocation40_spill] sm:$0xff] }
 0x2ea   :  { %v3992_v38 = vpop.eup %3991  ;;  %v2945_v40 = vsub.f32 %v2913_v54, %v2929_v7  ;;  %v1358_v52 = vadd.f32 %v3537_v18, %v199_v4  ;;  %v1323_v14 = vpop.f32.mrb[13].mxu0  ;;  %v2915_v25 = vadd.f32 %v2892_v17, %v2851_v55  ;;  %v2857_v61 = vld [vmem:[#allocation2 + $0x70] sm:$0xff]  ;;  %v3023_v54 = vadd.s32 4294967288, %v5435_v58 }
 0x2eb   :  { %v3994_v24 = vpop.eup %3993  ;;  %2993 = vperm.xlu0 %3905, %v2946_v8   ;;  %v2898_v63 = vmul.f32 0.6931472, %v3992_v38  ;;  %v1357_v15 = vadd.f32 %v1323_v14, %v198_v26  ;;  %v2932_v23 = vld [vmem:[#allocation4 + $0x48] sm:$0xff]  ;;  %v5111_v4 = vshrl.u32 %v5434_v49, 7  ;;  %v3030_v17 = vadd.s32 4294967280, %v5435_v58 }
 0x2ec   :  { %2990 = vperm.xlu1 %3906, %v2945_v40   ;;  %v2896_v42 = vmul.f32 0.6931472, %v3994_v24  ;;  %1375 = vst.msk [vmem:[#allocation4 + $0x68] sm:$0xff] %vm16_vm1, %v1358_v52  ;;  %v2948_v45 = vsub.f32 %v2916_v35, %v2932_v23  ;;  %v2931_v29 = vld [vmem:[#allocation4 + $0x40] sm:$0xff]  ;;  %v3037_v38 = vadd.s32 4294967272, %v5435_v58  ;;  %v3044_v40 = vadd.s32 4294967264, %v5435_v58 }
 0x2ed   :  { %1374 = vst.msk [vmem:[#allocation4 + $0x60] sm:$0xff] %vm16_vm1, %v1357_v15  ;;  %v3540_v57 = vpop.f32.mrb[14].mxu0  ;;  %v2947_v43 = vsub.f32 %v2915_v25, %v2931_v29  ;;  %v2918_v33 = vadd.f32 %v2898_v63, %v2854_v56  ;;  %v3026_v6 = vsub.s32 %v3023_v54, %v5111_v4  ;;  %v3021_v8 = vsub.s32 %v5435_v58, %v5111_v4 }
 0x2ee   :  { %v3996_v34 = vpop.eup %3995  ;;  %v1360_v19 = vadd.f32 %v3540_v57, %v201_v16  ;;  %v1335_v9 = vpop.f32.mrb[15].mxu0  ;;  %v2917_v46 = vadd.f32 %v2896_v42, %v2853_v39  ;;  %v3033_v18 = vsub.s32 %v3030_v17, %v5111_v4  ;;  %v3040_v14 = vsub.s32 %v3037_v38, %v5111_v4 }
 0x2ef   :  { %v3998_v51 = vpop.eup %3997  ;;  %2999 = vperm.xlu0 %3905, %v2948_v45   ;;  %v2902_v12 = vmul.f32 0.6931472, %v3996_v34  ;;  %v1359_v47 = vadd.f32 %v1335_v9, %v200_v60  ;;  %v2934_v21 = vld [vmem:[#allocation4 + $0x58] sm:$0xff]  ;;  %v3051_v55 = vadd.s32 4294967256, %v5435_v58  ;;  %v3047_v15 = vsub.s32 %v3044_v40, %v5111_v4 }
 0x2f0   :  { %2996 = vperm.xlu1 %3906, %v2947_v43   ;;  %v2900_v5 = vmul.f32 0.6931472, %v3998_v51  ;;  %1377 = vst.msk [vmem:[#allocation4 + $0x78] sm:$0xff] %vm16_vm1, %v1360_v19  ;;  %v2950_v13 = vsub.f32 %v2918_v33, %v2934_v21  ;;  %v2933_v3 = vld [vmem:[#allocation4 + $0x50] sm:$0xff]  ;;  %v3058_v16 = vadd.s32 4294967248, %v5435_v58  ;;  %v3065_v34 = vadd.s32 4294967240, %v5435_v58 }
 0x2f1   :  { %1376 = vst.msk [vmem:[#allocation4 + $0x70] sm:$0xff] %vm16_vm1, %v1359_v47  ;;  %v2949_v30 = vsub.f32 %v2917_v46, %v2933_v3  ;;  %v2920_v2 = vadd.f32 %v2902_v12, %v2856_v27  ;;  %vm3035_vm1 = vcmask 195712   ;;  %v3054_v60 = vsub.s32 %v3051_v55, %v5111_v4 }
 0x2f2   :  { %v4000_v50 = vpop.eup %3999  ;;  %v2919_v37 = vadd.f32 %v2900_v5, %v2855_v10  ;;  %v3061_v43 = vsub.s32 %v3058_v16, %v5111_v4  ;;  %v3072_v56 = vadd.s32 4294967232, %v5435_v58  ;;  %v3068_v39 = vsub.s32 %v3065_v34, %v5111_v4 }
 0x2f3   :  { %v4002_v59 = vpop.eup %4001  ;;  %3005 = vperm.xlu0 %3905, %v2950_v13   ;;  %v2906_v53 = vmul.f32 0.6931472, %v4000_v50  ;;  %v2936_v44 = vld [vmem:[#allocation4 + $0x68] sm:$0xff]  ;;  %v3079_v47 = vadd.s32 4294967224, %v5435_v58  ;;  %v3086_v5 = vadd.s32 4294967216, %v5435_v58 }
 0x2f4   :  { %3002 = vperm.xlu1 %3906, %v2949_v30   ;;  %v2904_v62 = vmul.f32 0.6931472, %v4002_v59  ;;  %v2952_v1 = vsub.f32 %v2920_v2, %v2936_v44  ;;  %v2935_v41 = vld [vmem:[#allocation4 + $0x60] sm:$0xff]  ;;  %v3075_v46 = vsub.s32 %v3072_v56, %v5111_v4  ;;  %v3093_v2 = vadd.s32 4294967208, %v5435_v58 }
 0x2f5   :  { %v2951_v32 = vsub.f32 %v2919_v37, %v2935_v41  ;;  %v2922_v48 = vadd.f32 %v2906_v53, %v2858_v0  ;;  %v3082_v27 = vsub.s32 %v3079_v47, %v5111_v4  ;;  %v3089_v53 = vsub.s32 %v3086_v5, %v5111_v4 }
 0x2f6   :  { %v2921_v31 = vadd.f32 %v2904_v62, %v2857_v61  ;;  %v3100_v44 = vadd.s32 4294967200, %v5435_v58 }
 0x2f7   :  { %3011 = vperm.xlu0 %3905, %v2952_v1   ;;  %v2938_v11 = vld [vmem:[#allocation4 + $0x78] sm:$0xff] }
 0x2f8   :  { %3008 = vperm.xlu1 %3906, %v2951_v32   ;;  %v2954_v22 = vsub.f32 %v2922_v48, %v2938_v11  ;;  %v2937_v20 = vld [vmem:[#allocation4 + $0x70] sm:$0xff]  ;;  %v3096_v32 = vsub.s32 %v3093_v2, %v5111_v4  ;;  %v3107_v48 = vadd.s32 4294967192, %v5435_v58  ;;  %v3103_v11 = vsub.s32 %v3100_v44, %v5111_v4 }
 0x2f9   :  { %v2953_v28 = vsub.f32 %v2921_v31, %v2937_v20  ;;  %v3114_v31 = vadd.s32 4294967184, %v5435_v58  ;;  %v3121_v20 = vadd.s32 4294967176, %v5435_v58 }
 0x2fa   :  { %v3110_v17 = vsub.s32 %v3107_v48, %v5111_v4 }
 0x2fb   :  { %3017 = vperm.xlu0 %3905, %v2954_v22   ;;  %v3124_v38 = vsub.s32 %v3121_v20, %v5111_v4 }
 0x2fc   :  { %3014 = vperm.xlu1 %3906, %v2953_v28  }
 0x35e   :  { %v2976_v26 = vpop.permute.xlu0 %2975 }
 0x35f   :  { %v2973_v7 = vpop.permute.xlu1 %2972  ;;  %v3027_v36 = vrot.slane %v2976_v26, %v3026_v6  ;;  %v3117_v26 = vsub.s32 %v3114_v31, %v5111_v4 }
 0x360   :  { %v3022_v24 = vrot.slane %v2973_v7, %v3021_v8 }
 0x362   :  { %v2982_v52 = vpop.permute.xlu0 %2981  ;;  %v3029_v23 = vsel %vm3028_vm0, %v3027_v36, %v3022_v24 }
 0x363   :  { %v2979_v35 = vpop.permute.xlu1 %2978  ;;  %v3041_v45 = vrot.slane %v2982_v52, %v3040_v14 }
 0x364   :  { %v3034_v63 = vrot.slane %v2979_v35, %v3033_v18 }
 0x366   :  { %v3036_v25 = vsel %vm3035_vm1, %v3034_v63, %v3029_v23  ;;  %v2988_v42 = vpop.permute.xlu0 %2987 }
 0x367   :  { %v2985_v29 = vpop.permute.xlu1 %2984  ;;  %v3043_v51 = vsel %vm3042_vm4, %v3041_v45, %v3036_v25  ;;  %v3055_v33 = vrot.slane %v2988_v42, %v3054_v60 }
 0x368   :  { %v3048_v57 = vrot.slane %v2985_v29, %v3047_v15 }
 0x36a   :  { %v3050_v19 = vsel %vm3049_vm5, %v3048_v57, %v3043_v51  ;;  %v2994_v9 = vpop.permute.xlu0 %2993 }
 0x36b   :  { %v2991_v12 = vpop.permute.xlu1 %2990  ;;  %v3057_v13 = vsel %vm3056_vm6, %v3055_v33, %v3050_v19  ;;  %v3069_v30 = vrot.slane %v2994_v9, %v3068_v39 }
 0x36c   :  { %v3062_v21 = vrot.slane %v2991_v12, %v3061_v43 }
 0x36e   :  { %v3064_v3 = vsel %vm3063_vm7, %v3062_v21, %v3057_v13  ;;  %v3000_v50 = vpop.permute.xlu0 %2999 }
 0x36f   :  { %v2997_v59 = vpop.permute.xlu1 %2996  ;;  %v3071_v37 = vsel %vm3070_vm8, %v3069_v30, %v3064_v3  ;;  %v3083_v41 = vrot.slane %v3000_v50, %v3082_v27 }
 0x370   :  { %v3076_v10 = vrot.slane %v2997_v59, %v3075_v46 }
 0x372   :  { %v3078_v62 = vsel %vm3077_vm9, %v3076_v10, %v3071_v37  ;;  %v3006_v1 = vpop.permute.xlu0 %3005 }
 0x373   :  { %v3003_v0 = vpop.permute.xlu1 %3002  ;;  %v3085_v22 = vsel %vm3084_vm10, %v3083_v41, %v3078_v62  ;;  %v3097_v54 = vrot.slane %v3006_v1, %v3096_v32 }
 0x374   :  { %v3090_v61 = vrot.slane %v3003_v0, %v3089_v53 }
 0x376   :  { %v3092_v28 = vsel %vm3091_vm11, %v3090_v61, %v3085_v22  ;;  %v3012_v49 = vpop.permute.xlu0 %3011 }
 0x377   :  { %v3009_v6 = vpop.permute.xlu1 %3008  ;;  %v3099_v7 = vsel %vm3098_vm12, %v3097_v54, %v3092_v28  ;;  %v3111_v36 = vrot.slane %v3012_v49, %v3110_v17 }
 0x378   :  { %v3104_v8 = vrot.slane %v3009_v6, %v3103_v11 }
 0x37a   :  { %v3106_v18 = vsel %vm3105_vm13, %v3104_v8, %v3099_v7  ;;  %v3018_v40 = vpop.permute.xlu0 %3017 }
 0x37b   :  { %v3015_v24 = vpop.permute.xlu1 %3014  ;;  %v3125_v52 = vrot.slane %v3018_v40, %v3124_v38  ;;  %v3113_v14 = vsel %vm3112_vm14, %v3111_v36, %v3106_v18 }
 0x37c   :  { %v3118_v58 = vrot.slane %v3015_v24, %v3117_v26 }
 0x37e   :  { %v3120_v35 = vsel %vm3119_vm15, %v3118_v58, %v3113_v14 }
 0x37f   :  { %v3127_v55 = vsel %vm3126_vm2, %v3125_v52, %v3120_v35 }
 0x380   :  { %3129 = vst [vmem:[#allocation5] sm:$0x1] %v3127_v55 }
 0x381   :  { %4014 = shalt.err (!%p4011_p4)
}
 0x382   :  { %s4015_s19 = scalar_lea.hbm %s5159_s2, 16 }
 0x383   :  { %p4016_p5 = scmp.ne.s32.totalorder %s5159_s2, %s4015_s19  ;;  %p4019_p6 = scmp.lt.u32.totalorder %s4015_s19, %s5159_s2 }
 0x385   :  { %p4021_p7 = pnand %p4019_p6, %p4016_p5 }
 0x387   :  { %4024 = shalt.err (!%p4021_p7)
}
 0x388   :  { %3139 = dma.vmem_to_hbm [thread:$0]  %s3137_s14, 16, %s5159_s2, [#allocation6]  }
 0x389   :  { %4025 = dma.done.wait [#allocation6], 16  }
 0x38a   :  { %4026 = vsyncadd [#allocation6], 4294967280 }
 0x38b   :  { %3143 = vsyncpa [#allocation6], 1 }

</bundles_post_ra>
